<compile_context>
chip_gen: v7x
topology: tpu7x:2x2x1
jax: 0.10.0
libtpu: 0.0.40
codegen_flags: <defaults>
</compile_context>

<pallas_src>
import functools

import numpy as np

import jax
import jax.numpy as jnp
from jax.experimental import pallas as pl
from jax.experimental.pallas import tpu as pltpu

EPS = 1e-5                      # nn.BatchNorm2d default eps
_VMEM_LIMIT = 32 * 1024 * 1024  # fits v5e / v6e / v7x scoped-VMEM budgets


def _shift_lanes(x, d):
    """shifted[..., p] = x[..., p + d] if 0 <= p + d < L else 0 (static d)."""
    if d == 0:
        return x
    L = x.shape[-1]
    pad = jnp.zeros(x.shape[:-1] + (abs(d),), x.dtype)
    if d > 0:
        return jnp.concatenate([x[..., d:], pad], axis=-1)
    return jnp.concatenate([pad, x[..., :L + d]], axis=-1)


def _conv3x3_lanes(x_img, w, masks, C, H, W):
    """3x3 'same' conv of one image in (C, H*W) lane-flattened layout (VPU).

    x_img: (C, H*W) f32       channels on sublanes, pixels on lanes
    w:     (C_out, C_in*9)    PyTorch weight reshaped; column ci*9+k is tap
                              k = (dy+1)*3 + (dx+1) of input channel ci
    masks: (9, H*W) f32       1.0 where the shifted pixel is inside the image
    """
    acc = jnp.zeros((C, H * W), jnp.float32)
    for dy in (-1, 0, 1):
        for dx in (-1, 0, 1):
            k = (dy + 1) * 3 + (dx + 1)
            # pixel p of `tap` holds x[:, h+dy, w+dx] (0 outside the image)
            tap = _shift_lanes(x_img, dy * W + dx) * masks[k:k + 1, :]
            for ci in range(C):
                col = w[:, ci * 9 + k:ci * 9 + k + 1]        # (C_out, 1)
                acc = acc + col * tap[ci:ci + 1, :]          # VPU broadcast FMA
    return acc


def _stats_kernel(x_ref, w_ref, mask_ref, sum_ref, sumsq_ref, *, C, H, W):
    """Pass 1: conv2(x) + accumulate global per-channel sum / sum-of-squares."""
    @pl.when(pl.program_id(0) == 0)
    def _init():
        sum_ref[...] = jnp.zeros_like(sum_ref)
        sumsq_ref[...] = jnp.zeros_like(sumsq_ref)

    x_img = x_ref[0].astype(jnp.float32)                       # (C, H*W)
    y = _conv3x3_lanes(x_img, w_ref[...], mask_ref[...], C, H, W)
    sum_ref[...] += jnp.sum(y, axis=1, keepdims=True)          # (C, 1)
    sumsq_ref[...] += jnp.sum(y * y, axis=1, keepdims=True)    # (C, 1)


def _apply_kernel(x_ref, w_ref, mask_ref, sum_ref, sumsq_ref, gamma_ref,
                  beta_ref, out_ref, *, C, H, W, inv_count):
    """Pass 2: conv2(x) + BatchNorm(train, global stats) + residual add."""
    x_img = x_ref[0].astype(jnp.float32)                       # (C, H*W)
    y = _conv3x3_lanes(x_img, w_ref[...], mask_ref[...], C, H, W)

    mean = sum_ref[...] * inv_count                            # (C, 1)
    var = sumsq_ref[...] * inv_count - mean * mean             # biased (PyTorch BN)
    inv_std = jax.lax.rsqrt(var + EPS)
    scale = gamma_ref[...] * inv_std                           # (C, 1)
    shift = beta_ref[...] - mean * scale                       # (C, 1)

    out_ref[0] = (y * scale + shift + x_img).astype(out_ref.dtype)


def _tap_masks(H, W):
    """(9, H*W) validity masks for the 9 conv taps (built on host, tiny)."""
    h = np.arange(H)[:, None]
    w = np.arange(W)[None, :]
    rows = []
    for dy in (-1, 0, 1):
        for dx in (-1, 0, 1):
            valid = (h + dy >= 0) & (h + dy < H) & (w + dx >= 0) & (w + dx < W)
            rows.append(valid.reshape(-1))
    return jnp.asarray(np.stack(rows), dtype=jnp.float32)


def residule_block_forward(x_nchw, params):
    """NCHW in / NCHW out, matching the PyTorch module's forward."""
    N, C, H, W = x_nchw.shape
    L = H * W

    x_flat = x_nchw.reshape(N, C, L)                  # free reshape, no HBM pass
    w2 = params["conv2_w"].reshape(C, C * 9).astype(jnp.float32)
    masks = _tap_masks(H, W)
    gamma = params["bn2_gamma"].reshape(C, 1).astype(jnp.float32)
    beta = params["bn2_beta"].reshape(C, 1).astype(jnp.float32)

    img_spec = pl.BlockSpec((1, C, L), lambda n: (n, 0, 0))
    w_spec = pl.BlockSpec((C, C * 9), lambda n: (0, 0))
    mask_spec = pl.BlockSpec((9, L), lambda n: (0, 0))
    col_spec = pl.BlockSpec((C, 1), lambda n: (0, 0))

    # Pass 1: global per-channel sum / sum-of-squares of conv2(x).
    ch_sum, ch_sumsq = pl.pallas_call(
        functools.partial(_stats_kernel, C=C, H=H, W=W),
        out_shape=(jax.ShapeDtypeStruct((C, 1), jnp.float32),
                   jax.ShapeDtypeStruct((C, 1), jnp.float32)),
        grid=(N,),
        in_specs=[img_spec, w_spec, mask_spec],
        out_specs=(col_spec, col_spec),
        compiler_params=pltpu.CompilerParams(
            dimension_semantics=("arbitrary",),       # accumulator across grid
            vmem_limit_bytes=_VMEM_LIMIT),
    )(x_flat, w2, masks)

    # Pass 2: conv + normalize + residual, fully parallel over images.
    out_flat = pl.pallas_call(
        functools.partial(_apply_kernel, C=C, H=H, W=W,
                          inv_count=1.0 / float(N * H * W)),
        out_shape=jax.ShapeDtypeStruct((N, C, L), x_nchw.dtype),
        grid=(N,),
        in_specs=[img_spec, w_spec, mask_spec, col_spec, col_spec,
                  col_spec, col_spec],
        out_specs=img_spec,
        compiler_params=pltpu.CompilerParams(
            dimension_semantics=("parallel",),        # 2 TensorCores on v7x
            vmem_limit_bytes=_VMEM_LIMIT),
    )(x_flat, w2, masks, ch_sum, ch_sumsq, gamma, beta)

    return out_flat.reshape(N, C, H, W)               # free reshape back


def _reference(x_nchw, params):
    """Pure-JAX reference of the effective PyTorch forward (for verification)."""
    y = jax.lax.conv_general_dilated(
        x_nchw, params["conv2_w"], window_strides=(1, 1), padding="SAME",
        dimension_numbers=("NCHW", "OIHW", "NCHW"))
    mean = y.mean(axis=(0, 2, 3), keepdims=True)
    var = ((y - mean) ** 2).mean(axis=(0, 2, 3), keepdims=True)
    yn = (y - mean) / jnp.sqrt(var + EPS)
    yn = yn * params["bn2_gamma"].reshape(1, -1, 1, 1) + params["bn2_beta"].reshape(1, -1, 1, 1)
    return yn + x_nchw


if __name__ == "__main__":
    N, C, H, W = 2, 4, 16, 16
    key = jax.random.PRNGKey(0)
    k_x, k_w1, k_w2 = jax.random.split(key, 3)

    x = jax.random.normal(k_x, (N, C, H, W), dtype=jnp.float32)

    params = {
        # conv1/bn1/relu1 parameters exist in __init__ but their outputs are
        # unused in the original forward (dead code); kept for shape fidelity.
        "conv1_w": jax.random.normal(k_w1, (C, C, 3, 3), dtype=jnp.float32) * 0.1,
        "bn1_gamma": jnp.ones((C,), jnp.float32),
        "bn1_beta": jnp.zeros((C,), jnp.float32),
        # effective path: conv2 + bn2 (PyTorch BN init: weight=1, bias=0)
        "conv2_w": jax.random.normal(k_w2, (C, C, 3, 3), dtype=jnp.float32) * 0.1,
        "bn2_gamma": jnp.ones((C,), jnp.float32),
        "bn2_beta": jnp.zeros((C,), jnp.float32),
    }

    out = jax.jit(residule_block_forward)(x, params)
    out = jax.block_until_ready(out)

    ref = _reference(x, params)
    assert out.shape == (N, C, H, W)
    assert jnp.allclose(out, ref, atol=5e-4, rtol=5e-4), float(jnp.max(jnp.abs(out - ref)))

    print("KERNEL_OK")
</pallas_src>

<mosaic_0001>
module attributes {stable_mosaic.version = 11 : i64} {
  func.func @_stats_kernel(%arg0: i32, %arg1: memref<1x4x256xf32, #tpu.memory_space<vmem>>, %arg2: memref<4x36xf32, #tpu.memory_space<vmem>>, %arg3: memref<9x256xf32, #tpu.memory_space<vmem>>, %arg4: memref<4x1xf32, #tpu.memory_space<vmem>>, %arg5: memref<4x1xf32, #tpu.memory_space<vmem>>) attributes {dimension_semantics = [#tpu.dimension_semantics<arbitrary>], iteration_bounds = array<i64: 2>, scalar_prefetch = 0 : i64, scratch_operands = 0 : i64, tpu.core_type = #tpu.core_type<tc>, window_params = [{transform_indices = @transform_0, window_bounds = array<i64: 1, 4, 256>}, {pipeline_mode = #tpu.pipeline_mode<synchronous>, transform_indices = @transform_1, window_bounds = array<i64: 4, 36>}, {pipeline_mode = #tpu.pipeline_mode<synchronous>, transform_indices = @transform_2, window_bounds = array<i64: 9, 256>}, {pipeline_mode = #tpu.pipeline_mode<synchronous>, transform_indices = @transform_3, window_bounds = array<i64: 4, 1>}, {pipeline_mode = #tpu.pipeline_mode<synchronous>, transform_indices = @transform_4, window_bounds = array<i64: 4, 1>}]} {
    %c0_i32 = arith.constant 0 : i32
    %0 = arith.cmpi eq, %arg0, %c0_i32 : i32
    %1 = arith.extui %0 : i1 to i32
    %c0_i32_0 = arith.constant 0 : i32
    %2 = arith.cmpi ne, %1, %c0_i32_0 : i32
    scf.if %2 {
      %cst_25 = arith.constant 0.000000e+00 : f32
      %286 = vector.broadcast %cst_25 : f32 to vector<4x1xf32>
      %c0_26 = arith.constant 0 : index
      %c0_27 = arith.constant 0 : index
      %287 = vector.load %arg4[%c0_26, %c0_27] : memref<4x1xf32, #tpu.memory_space<vmem>>, vector<4x1xf32>
      tpu.vector_store %arg4[%c0_26, %c0_27], %286 {strides = array<i32>} : memref<4x1xf32, #tpu.memory_space<vmem>>, vector<4x1xf32>,
      %cst_28 = arith.constant 0.000000e+00 : f32
      %288 = vector.broadcast %cst_28 : f32 to vector<4x1xf32>
      %c0_29 = arith.constant 0 : index
      %c0_30 = arith.constant 0 : index
      %289 = vector.load %arg5[%c0_29, %c0_30] : memref<4x1xf32, #tpu.memory_space<vmem>>, vector<4x1xf32>
      tpu.vector_store %arg5[%c0_29, %c0_30], %288 {strides = array<i32>} : memref<4x1xf32, #tpu.memory_space<vmem>>, vector<4x1xf32>,
    } else {
    }
    %c0 = arith.constant 0 : index
    %c0_1 = arith.constant 0 : index
    %c0_2 = arith.constant 0 : index
    %3 = vector.load %arg1[%c0, %c0_1, %c0_2] : memref<1x4x256xf32, #tpu.memory_space<vmem>>, vector<1x4x256xf32>
    %4 = vector.shape_cast %3 : vector<1x4x256xf32> to vector<4x256xf32>
    %c0_3 = arith.constant 0 : index
    %c0_4 = arith.constant 0 : index
    %5 = vector.load %arg2[%c0_3, %c0_4] : memref<4x36xf32, #tpu.memory_space<vmem>>, vector<4x36xf32>
    %c0_5 = arith.constant 0 : index
    %c0_6 = arith.constant 0 : index
    %6 = vector.load %arg3[%c0_5, %c0_6] : memref<9x256xf32, #tpu.memory_space<vmem>>, vector<9x256xf32>
    %cst = arith.constant 0.000000e+00 : f32
    %7 = vector.broadcast %cst : f32 to vector<4x256xf32>
    %cst_7 = arith.constant 0.000000e+00 : f32
    %8 = vector.broadcast %cst_7 : f32 to vector<4x17xf32>
    %9 = vector.extract_strided_slice %4 {offsets = [0, 0], sizes = [4, 239], strides = [1, 1]} : vector<4x256xf32> to vector<4x239xf32>
    %10 = tpu.concatenate %8, %9 in 1 : vector<4x17xf32>, vector<4x239xf32> -> vector<4x256xf32>
    %11 = vector.extract_strided_slice %6 {offsets = [0, 0], sizes = [1, 256], strides = [1, 1]} : vector<9x256xf32> to vector<1x256xf32>
    %12 = vector.broadcast %11 : vector<1x256xf32> to vector<4x256xf32>
    %13 = arith.mulf %10, %12 : vector<4x256xf32>
    %14 = vector.extract_strided_slice %5 {offsets = [0, 0], sizes = [4, 1], strides = [1, 1]} : vector<4x36xf32> to vector<4x1xf32>
    %15 = vector.extract_strided_slice %13 {offsets = [0, 0], sizes = [1, 256], strides = [1, 1]} : vector<4x256xf32> to vector<1x256xf32>
    %16 = vector.broadcast %14 : vector<4x1xf32> to vector<4x256xf32>
    %17 = vector.broadcast %15 : vector<1x256xf32> to vector<4x256xf32>
    %18 = arith.mulf %16, %17 : vector<4x256xf32>
    %19 = arith.addf %7, %18 : vector<4x256xf32>
    %20 = vector.extract_strided_slice %5 {offsets = [0, 9], sizes = [4, 1], strides = [1, 1]} : vector<4x36xf32> to vector<4x1xf32>
    %21 = vector.extract_strided_slice %13 {offsets = [1, 0], sizes = [1, 256], strides = [1, 1]} : vector<4x256xf32> to vector<1x256xf32>
    %22 = vector.broadcast %20 : vector<4x1xf32> to vector<4x256xf32>
    %23 = vector.broadcast %21 : vector<1x256xf32> to vector<4x256xf32>
    %24 = arith.mulf %22, %23 : vector<4x256xf32>
    %25 = arith.addf %19, %24 : vector<4x256xf32>
    %26 = vector.extract_strided_slice %5 {offsets = [0, 18], sizes = [4, 1], strides = [1, 1]} : vector<4x36xf32> to vector<4x1xf32>
    %27 = vector.extract_strided_slice %13 {offsets = [2, 0], sizes = [1, 256], strides = [1, 1]} : vector<4x256xf32> to vector<1x256xf32>
    %28 = vector.broadcast %26 : vector<4x1xf32> to vector<4x256xf32>
    %29 = vector.broadcast %27 : vector<1x256xf32> to vector<4x256xf32>
    %30 = arith.mulf %28, %29 : vector<4x256xf32>
    %31 = arith.addf %25, %30 : vector<4x256xf32>
    %32 = vector.extract_strided_slice %5 {offsets = [0, 27], sizes = [4, 1], strides = [1, 1]} : vector<4x36xf32> to vector<4x1xf32>
    %33 = vector.extract_strided_slice %13 {offsets = [3, 0], sizes = [1, 256], strides = [1, 1]} : vector<4x256xf32> to vector<1x256xf32>
    %34 = vector.broadcast %32 : vector<4x1xf32> to vector<4x256xf32>
    %35 = vector.broadcast %33 : vector<1x256xf32> to vector<4x256xf32>
    %36 = arith.mulf %34, %35 : vector<4x256xf32>
    %37 = arith.addf %31, %36 : vector<4x256xf32>
    %cst_8 = arith.constant 0.000000e+00 : f32
    %38 = vector.broadcast %cst_8 : f32 to vector<4x16xf32>
    %39 = vector.extract_strided_slice %4 {offsets = [0, 0], sizes = [4, 240], strides = [1, 1]} : vector<4x256xf32> to vector<4x240xf32>
    %40 = tpu.concatenate %38, %39 in 1 : vector<4x16xf32>, vector<4x240xf32> -> vector<4x256xf32>
    %41 = vector.extract_strided_slice %6 {offsets = [1, 0], sizes = [1, 256], strides = [1, 1]} : vector<9x256xf32> to vector<1x256xf32>
    %42 = vector.broadcast %41 : vector<1x256xf32> to vector<4x256xf32>
    %43 = arith.mulf %40, %42 : vector<4x256xf32>
    %44 = vector.extract_strided_slice %5 {offsets = [0, 1], sizes = [4, 1], strides = [1, 1]} : vector<4x36xf32> to vector<4x1xf32>
    %45 = vector.extract_strided_slice %43 {offsets = [0, 0], sizes = [1, 256], strides = [1, 1]} : vector<4x256xf32> to vector<1x256xf32>
    %46 = vector.broadcast %44 : vector<4x1xf32> to vector<4x256xf32>
    %47 = vector.broadcast %45 : vector<1x256xf32> to vector<4x256xf32>
    %48 = arith.mulf %46, %47 : vector<4x256xf32>
    %49 = arith.addf %37, %48 : vector<4x256xf32>
    %50 = vector.extract_strided_slice %5 {offsets = [0, 10], sizes = [4, 1], strides = [1, 1]} : vector<4x36xf32> to vector<4x1xf32>
    %51 = vector.extract_strided_slice %43 {offsets = [1, 0], sizes = [1, 256], strides = [1, 1]} : vector<4x256xf32> to vector<1x256xf32>
    %52 = vector.broadcast %50 : vector<4x1xf32> to vector<4x256xf32>
    %53 = vector.broadcast %51 : vector<1x256xf32> to vector<4x256xf32>
    %54 = arith.mulf %52, %53 : vector<4x256xf32>
    %55 = arith.addf %49, %54 : vector<4x256xf32>
    %56 = vector.extract_strided_slice %5 {offsets = [0, 19], sizes = [4, 1], strides = [1, 1]} : vector<4x36xf32> to vector<4x1xf32>
    %57 = vector.extract_strided_slice %43 {offsets = [2, 0], sizes = [1, 256], strides = [1, 1]} : vector<4x256xf32> to vector<1x256xf32>
    %58 = vector.broadcast %56 : vector<4x1xf32> to vector<4x256xf32>
    %59 = vector.broadcast %57 : vector<1x256xf32> to vector<4x256xf32>
    %60 = arith.mulf %58, %59 : vector<4x256xf32>
    %61 = arith.addf %55, %60 : vector<4x256xf32>
    %62 = vector.extract_strided_slice %5 {offsets = [0, 28], sizes = [4, 1], strides = [1, 1]} : vector<4x36xf32> to vector<4x1xf32>
    %63 = vector.extract_strided_slice %43 {offsets = [3, 0], sizes = [1, 256], strides = [1, 1]} : vector<4x256xf32> to vector<1x256xf32>
    %64 = vector.broadcast %62 : vector<4x1xf32> to vector<4x256xf32>
    %65 = vector.broadcast %63 : vector<1x256xf32> to vector<4x256xf32>
    %66 = arith.mulf %64, %65 : vector<4x256xf32>
    %67 = arith.addf %61, %66 : vector<4x256xf32>
    %cst_9 = arith.constant 0.000000e+00 : f32
    %68 = vector.broadcast %cst_9 : f32 to vector<4x15xf32>
    %69 = vector.extract_strided_slice %4 {offsets = [0, 0], sizes = [4, 241], strides = [1, 1]} : vector<4x256xf32> to vector<4x241xf32>
    %70 = tpu.concatenate %68, %69 in 1 : vector<4x15xf32>, vector<4x241xf32> -> vector<4x256xf32>
    %71 = vector.extract_strided_slice %6 {offsets = [2, 0], sizes = [1, 256], strides = [1, 1]} : vector<9x256xf32> to vector<1x256xf32>
    %72 = vector.broadcast %71 : vector<1x256xf32> to vector<4x256xf32>
    %73 = arith.mulf %70, %72 : vector<4x256xf32>
    %74 = vector.extract_strided_slice %5 {offsets = [0, 2], sizes = [4, 1], strides = [1, 1]} : vector<4x36xf32> to vector<4x1xf32>
    %75 = vector.extract_strided_slice %73 {offsets = [0, 0], sizes = [1, 256], strides = [1, 1]} : vector<4x256xf32> to vector<1x256xf32>
    %76 = vector.broadcast %74 : vector<4x1xf32> to vector<4x256xf32>
    %77 = vector.broadcast %75 : vector<1x256xf32> to vector<4x256xf32>
    %78 = arith.mulf %76, %77 : vector<4x256xf32>
    %79 = arith.addf %67, %78 : vector<4x256xf32>
    %80 = vector.extract_strided_slice %5 {offsets = [0, 11], sizes = [4, 1], strides = [1, 1]} : vector<4x36xf32> to vector<4x1xf32>
    %81 = vector.extract_strided_slice %73 {offsets = [1, 0], sizes = [1, 256], strides = [1, 1]} : vector<4x256xf32> to vector<1x256xf32>
    %82 = vector.broadcast %80 : vector<4x1xf32> to vector<4x256xf32>
    %83 = vector.broadcast %81 : vector<1x256xf32> to vector<4x256xf32>
    %84 = arith.mulf %82, %83 : vector<4x256xf32>
    %85 = arith.addf %79, %84 : vector<4x256xf32>
    %86 = vector.extract_strided_slice %5 {offsets = [0, 20], sizes = [4, 1], strides = [1, 1]} : vector<4x36xf32> to vector<4x1xf32>
    %87 = vector.extract_strided_slice %73 {offsets = [2, 0], sizes = [1, 256], strides = [1, 1]} : vector<4x256xf32> to vector<1x256xf32>
    %88 = vector.broadcast %86 : vector<4x1xf32> to vector<4x256xf32>
    %89 = vector.broadcast %87 : vector<1x256xf32> to vector<4x256xf32>
    %90 = arith.mulf %88, %89 : vector<4x256xf32>
    %91 = arith.addf %85, %90 : vector<4x256xf32>
    %92 = vector.extract_strided_slice %5 {offsets = [0, 29], sizes = [4, 1], strides = [1, 1]} : vector<4x36xf32> to vector<4x1xf32>
    %93 = vector.extract_strided_slice %73 {offsets = [3, 0], sizes = [1, 256], strides = [1, 1]} : vector<4x256xf32> to vector<1x256xf32>
    %94 = vector.broadcast %92 : vector<4x1xf32> to vector<4x256xf32>
    %95 = vector.broadcast %93 : vector<1x256xf32> to vector<4x256xf32>
    %96 = arith.mulf %94, %95 : vector<4x256xf32>
    %97 = arith.addf %91, %96 : vector<4x256xf32>
    %cst_10 = arith.constant 0.000000e+00 : f32
    %98 = vector.broadcast %cst_10 : f32 to vector<4x1xf32>
    %99 = vector.extract_strided_slice %4 {offsets = [0, 0], sizes = [4, 255], strides = [1, 1]} : vector<4x256xf32> to vector<4x255xf32>
    %100 = tpu.concatenate %98, %99 in 1 : vector<4x1xf32>, vector<4x255xf32> -> vector<4x256xf32>
    %101 = vector.extract_strided_slice %6 {offsets = [3, 0], sizes = [1, 256], strides = [1, 1]} : vector<9x256xf32> to vector<1x256xf32>
    %102 = vector.broadcast %101 : vector<1x256xf32> to vector<4x256xf32>
    %103 = arith.mulf %100, %102 : vector<4x256xf32>
    %104 = vector.extract_strided_slice %5 {offsets = [0, 3], sizes = [4, 1], strides = [1, 1]} : vector<4x36xf32> to vector<4x1xf32>
    %105 = vector.extract_strided_slice %103 {offsets = [0, 0], sizes = [1, 256], strides = [1, 1]} : vector<4x256xf32> to vector<1x256xf32>
    %106 = vector.broadcast %104 : vector<4x1xf32> to vector<4x256xf32>
    %107 = vector.broadcast %105 : vector<1x256xf32> to vector<4x256xf32>
    %108 = arith.mulf %106, %107 : vector<4x256xf32>
    %109 = arith.addf %97, %108 : vector<4x256xf32>
    %110 = vector.extract_strided_slice %5 {offsets = [0, 12], sizes = [4, 1], strides = [1, 1]} : vector<4x36xf32> to vector<4x1xf32>
    %111 = vector.extract_strided_slice %103 {offsets = [1, 0], sizes = [1, 256], strides = [1, 1]} : vector<4x256xf32> to vector<1x256xf32>
    %112 = vector.broadcast %110 : vector<4x1xf32> to vector<4x256xf32>
    %113 = vector.broadcast %111 : vector<1x256xf32> to vector<4x256xf32>
    %114 = arith.mulf %112, %113 : vector<4x256xf32>
    %115 = arith.addf %109, %114 : vector<4x256xf32>
    %116 = vector.extract_strided_slice %5 {offsets = [0, 21], sizes = [4, 1], strides = [1, 1]} : vector<4x36xf32> to vector<4x1xf32>
    %117 = vector.extract_strided_slice %103 {offsets = [2, 0], sizes = [1, 256], strides = [1, 1]} : vector<4x256xf32> to vector<1x256xf32>
    %118 = vector.broadcast %116 : vector<4x1xf32> to vector<4x256xf32>
    %119 = vector.broadcast %117 : vector<1x256xf32> to vector<4x256xf32>
    %120 = arith.mulf %118, %119 : vector<4x256xf32>
    %121 = arith.addf %115, %120 : vector<4x256xf32>
    %122 = vector.extract_strided_slice %5 {offsets = [0, 30], sizes = [4, 1], strides = [1, 1]} : vector<4x36xf32> to vector<4x1xf32>
    %123 = vector.extract_strided_slice %103 {offsets = [3, 0], sizes = [1, 256], strides = [1, 1]} : vector<4x256xf32> to vector<1x256xf32>
    %124 = vector.broadcast %122 : vector<4x1xf32> to vector<4x256xf32>
    %125 = vector.broadcast %123 : vector<1x256xf32> to vector<4x256xf32>
    %126 = arith.mulf %124, %125 : vector<4x256xf32>
    %127 = arith.addf %121, %126 : vector<4x256xf32>
    %128 = vector.extract_strided_slice %6 {offsets = [4, 0], sizes = [1, 256], strides = [1, 1]} : vector<9x256xf32> to vector<1x256xf32>
    %129 = vector.broadcast %128 : vector<1x256xf32> to vector<4x256xf32>
    %130 = arith.mulf %4, %129 : vector<4x256xf32>
    %131 = vector.extract_strided_slice %5 {offsets = [0, 4], sizes = [4, 1], strides = [1, 1]} : vector<4x36xf32> to vector<4x1xf32>
    %132 = vector.extract_strided_slice %130 {offsets = [0, 0], sizes = [1, 256], strides = [1, 1]} : vector<4x256xf32> to vector<1x256xf32>
    %133 = vector.broadcast %131 : vector<4x1xf32> to vector<4x256xf32>
    %134 = vector.broadcast %132 : vector<1x256xf32> to vector<4x256xf32>
    %135 = arith.mulf %133, %134 : vector<4x256xf32>
    %136 = arith.addf %127, %135 : vector<4x256xf32>
    %137 = vector.extract_strided_slice %5 {offsets = [0, 13], sizes = [4, 1], strides = [1, 1]} : vector<4x36xf32> to vector<4x1xf32>
    %138 = vector.extract_strided_slice %130 {offsets = [1, 0], sizes = [1, 256], strides = [1, 1]} : vector<4x256xf32> to vector<1x256xf32>
    %139 = vector.broadcast %137 : vector<4x1xf32> to vector<4x256xf32>
    %140 = vector.broadcast %138 : vector<1x256xf32> to vector<4x256xf32>
    %141 = arith.mulf %139, %140 : vector<4x256xf32>
    %142 = arith.addf %136, %141 : vector<4x256xf32>
    %143 = vector.extract_strided_slice %5 {offsets = [0, 22], sizes = [4, 1], strides = [1, 1]} : vector<4x36xf32> to vector<4x1xf32>
    %144 = vector.extract_strided_slice %130 {offsets = [2, 0], sizes = [1, 256], strides = [1, 1]} : vector<4x256xf32> to vector<1x256xf32>
    %145 = vector.broadcast %143 : vector<4x1xf32> to vector<4x256xf32>
    %146 = vector.broadcast %144 : vector<1x256xf32> to vector<4x256xf32>
    %147 = arith.mulf %145, %146 : vector<4x256xf32>
    %148 = arith.addf %142, %147 : vector<4x256xf32>
    %149 = vector.extract_strided_slice %5 {offsets = [0, 31], sizes = [4, 1], strides = [1, 1]} : vector<4x36xf32> to vector<4x1xf32>
    %150 = vector.extract_strided_slice %130 {offsets = [3, 0], sizes = [1, 256], strides = [1, 1]} : vector<4x256xf32> to vector<1x256xf32>
    %151 = vector.broadcast %149 : vector<4x1xf32> to vector<4x256xf32>
    %152 = vector.broadcast %150 : vector<1x256xf32> to vector<4x256xf32>
    %153 = arith.mulf %151, %152 : vector<4x256xf32>
    %154 = arith.addf %148, %153 : vector<4x256xf32>
    %cst_11 = arith.constant 0.000000e+00 : f32
    %155 = vector.broadcast %cst_11 : f32 to vector<4x1xf32>
    %156 = vector.extract_strided_slice %4 {offsets = [0, 1], sizes = [4, 255], strides = [1, 1]} : vector<4x256xf32> to vector<4x255xf32>
    %157 = tpu.concatenate %156, %155 in 1 : vector<4x255xf32>, vector<4x1xf32> -> vector<4x256xf32>
    %158 = vector.extract_strided_slice %6 {offsets = [5, 0], sizes = [1, 256], strides = [1, 1]} : vector<9x256xf32> to vector<1x256xf32>
    %159 = vector.broadcast %158 : vector<1x256xf32> to vector<4x256xf32>
    %160 = arith.mulf %157, %159 : vector<4x256xf32>
    %161 = vector.extract_strided_slice %5 {offsets = [0, 5], sizes = [4, 1], strides = [1, 1]} : vector<4x36xf32> to vector<4x1xf32>
    %162 = vector.extract_strided_slice %160 {offsets = [0, 0], sizes = [1, 256], strides = [1, 1]} : vector<4x256xf32> to vector<1x256xf32>
    %163 = vector.broadcast %161 : vector<4x1xf32> to vector<4x256xf32>
    %164 = vector.broadcast %162 : vector<1x256xf32> to vector<4x256xf32>
    %165 = arith.mulf %163, %164 : vector<4x256xf32>
    %166 = arith.addf %154, %165 : vector<4x256xf32>
    %167 = vector.extract_strided_slice %5 {offsets = [0, 14], sizes = [4, 1], strides = [1, 1]} : vector<4x36xf32> to vector<4x1xf32>
    %168 = vector.extract_strided_slice %160 {offsets = [1, 0], sizes = [1, 256], strides = [1, 1]} : vector<4x256xf32> to vector<1x256xf32>
    %169 = vector.broadcast %167 : vector<4x1xf32> to vector<4x256xf32>
    %170 = vector.broadcast %168 : vector<1x256xf32> to vector<4x256xf32>
    %171 = arith.mulf %169, %170 : vector<4x256xf32>
    %172 = arith.addf %166, %171 : vector<4x256xf32>
    %173 = vector.extract_strided_slice %5 {offsets = [0, 23], sizes = [4, 1], strides = [1, 1]} : vector<4x36xf32> to vector<4x1xf32>
    %174 = vector.extract_strided_slice %160 {offsets = [2, 0], sizes = [1, 256], strides = [1, 1]} : vector<4x256xf32> to vector<1x256xf32>
    %175 = vector.broadcast %173 : vector<4x1xf32> to vector<4x256xf32>
    %176 = vector.broadcast %174 : vector<1x256xf32> to vector<4x256xf32>
    %177 = arith.mulf %175, %176 : vector<4x256xf32>
    %178 = arith.addf %172, %177 : vector<4x256xf32>
    %179 = vector.extract_strided_slice %5 {offsets = [0, 32], sizes = [4, 1], strides = [1, 1]} : vector<4x36xf32> to vector<4x1xf32>
    %180 = vector.extract_strided_slice %160 {offsets = [3, 0], sizes = [1, 256], strides = [1, 1]} : vector<4x256xf32> to vector<1x256xf32>
    %181 = vector.broadcast %179 : vector<4x1xf32> to vector<4x256xf32>
    %182 = vector.broadcast %180 : vector<1x256xf32> to vector<4x256xf32>
    %183 = arith.mulf %181, %182 : vector<4x256xf32>
    %184 = arith.addf %178, %183 : vector<4x256xf32>
    %cst_12 = arith.constant 0.000000e+00 : f32
    %185 = vector.broadcast %cst_12 : f32 to vector<4x15xf32>
    %186 = vector.extract_strided_slice %4 {offsets = [0, 15], sizes = [4, 241], strides = [1, 1]} : vector<4x256xf32> to vector<4x241xf32>
    %187 = tpu.concatenate %186, %185 in 1 : vector<4x241xf32>, vector<4x15xf32> -> vector<4x256xf32>
    %188 = vector.extract_strided_slice %6 {offsets = [6, 0], sizes = [1, 256], strides = [1, 1]} : vector<9x256xf32> to vector<1x256xf32>
    %189 = vector.broadcast %188 : vector<1x256xf32> to vector<4x256xf32>
    %190 = arith.mulf %187, %189 : vector<4x256xf32>
    %191 = vector.extract_strided_slice %5 {offsets = [0, 6], sizes = [4, 1], strides = [1, 1]} : vector<4x36xf32> to vector<4x1xf32>
    %192 = vector.extract_strided_slice %190 {offsets = [0, 0], sizes = [1, 256], strides = [1, 1]} : vector<4x256xf32> to vector<1x256xf32>
    %193 = vector.broadcast %191 : vector<4x1xf32> to vector<4x256xf32>
    %194 = vector.broadcast %192 : vector<1x256xf32> to vector<4x256xf32>
    %195 = arith.mulf %193, %194 : vector<4x256xf32>
    %196 = arith.addf %184, %195 : vector<4x256xf32>
    %197 = vector.extract_strided_slice %5 {offsets = [0, 15], sizes = [4, 1], strides = [1, 1]} : vector<4x36xf32> to vector<4x1xf32>
    %198 = vector.extract_strided_slice %190 {offsets = [1, 0], sizes = [1, 256], strides = [1, 1]} : vector<4x256xf32> to vector<1x256xf32>
    %199 = vector.broadcast %197 : vector<4x1xf32> to vector<4x256xf32>
    %200 = vector.broadcast %198 : vector<1x256xf32> to vector<4x256xf32>
    %201 = arith.mulf %199, %200 : vector<4x256xf32>
    %202 = arith.addf %196, %201 : vector<4x256xf32>
    %203 = vector.extract_strided_slice %5 {offsets = [0, 24], sizes = [4, 1], strides = [1, 1]} : vector<4x36xf32> to vector<4x1xf32>
    %204 = vector.extract_strided_slice %190 {offsets = [2, 0], sizes = [1, 256], strides = [1, 1]} : vector<4x256xf32> to vector<1x256xf32>
    %205 = vector.broadcast %203 : vector<4x1xf32> to vector<4x256xf32>
    %206 = vector.broadcast %204 : vector<1x256xf32> to vector<4x256xf32>
    %207 = arith.mulf %205, %206 : vector<4x256xf32>
    %208 = arith.addf %202, %207 : vector<4x256xf32>
    %209 = vector.extract_strided_slice %5 {offsets = [0, 33], sizes = [4, 1], strides = [1, 1]} : vector<4x36xf32> to vector<4x1xf32>
    %210 = vector.extract_strided_slice %190 {offsets = [3, 0], sizes = [1, 256], strides = [1, 1]} : vector<4x256xf32> to vector<1x256xf32>
    %211 = vector.broadcast %209 : vector<4x1xf32> to vector<4x256xf32>
    %212 = vector.broadcast %210 : vector<1x256xf32> to vector<4x256xf32>
    %213 = arith.mulf %211, %212 : vector<4x256xf32>
    %214 = arith.addf %208, %213 : vector<4x256xf32>
    %cst_13 = arith.constant 0.000000e+00 : f32
    %215 = vector.broadcast %cst_13 : f32 to vector<4x16xf32>
    %216 = vector.extract_strided_slice %4 {offsets = [0, 16], sizes = [4, 240], strides = [1, 1]} : vector<4x256xf32> to vector<4x240xf32>
    %217 = tpu.concatenate %216, %215 in 1 : vector<4x240xf32>, vector<4x16xf32> -> vector<4x256xf32>
    %218 = vector.extract_strided_slice %6 {offsets = [7, 0], sizes = [1, 256], strides = [1, 1]} : vector<9x256xf32> to vector<1x256xf32>
    %219 = vector.broadcast %218 : vector<1x256xf32> to vector<4x256xf32>
    %220 = arith.mulf %217, %219 : vector<4x256xf32>
    %221 = vector.extract_strided_slice %5 {offsets = [0, 7], sizes = [4, 1], strides = [1, 1]} : vector<4x36xf32> to vector<4x1xf32>
    %222 = vector.extract_strided_slice %220 {offsets = [0, 0], sizes = [1, 256], strides = [1, 1]} : vector<4x256xf32> to vector<1x256xf32>
    %223 = vector.broadcast %221 : vector<4x1xf32> to vector<4x256xf32>
    %224 = vector.broadcast %222 : vector<1x256xf32> to vector<4x256xf32>
    %225 = arith.mulf %223, %224 : vector<4x256xf32>
    %226 = arith.addf %214, %225 : vector<4x256xf32>
    %227 = vector.extract_strided_slice %5 {offsets = [0, 16], sizes = [4, 1], strides = [1, 1]} : vector<4x36xf32> to vector<4x1xf32>
    %228 = vector.extract_strided_slice %220 {offsets = [1, 0], sizes = [1, 256], strides = [1, 1]} : vector<4x256xf32> to vector<1x256xf32>
    %229 = vector.broadcast %227 : vector<4x1xf32> to vector<4x256xf32>
    %230 = vector.broadcast %228 : vector<1x256xf32> to vector<4x256xf32>
    %231 = arith.mulf %229, %230 : vector<4x256xf32>
    %232 = arith.addf %226, %231 : vector<4x256xf32>
    %233 = vector.extract_strided_slice %5 {offsets = [0, 25], sizes = [4, 1], strides = [1, 1]} : vector<4x36xf32> to vector<4x1xf32>
    %234 = vector.extract_strided_slice %220 {offsets = [2, 0], sizes = [1, 256], strides = [1, 1]} : vector<4x256xf32> to vector<1x256xf32>
    %235 = vector.broadcast %233 : vector<4x1xf32> to vector<4x256xf32>
    %236 = vector.broadcast %234 : vector<1x256xf32> to vector<4x256xf32>
    %237 = arith.mulf %235, %236 : vector<4x256xf32>
    %238 = arith.addf %232, %237 : vector<4x256xf32>
    %239 = vector.extract_strided_slice %5 {offsets = [0, 34], sizes = [4, 1], strides = [1, 1]} : vector<4x36xf32> to vector<4x1xf32>
    %240 = vector.extract_strided_slice %220 {offsets = [3, 0], sizes = [1, 256], strides = [1, 1]} : vector<4x256xf32> to vector<1x256xf32>
    %241 = vector.broadcast %239 : vector<4x1xf32> to vector<4x256xf32>
    %242 = vector.broadcast %240 : vector<1x256xf32> to vector<4x256xf32>
    %243 = arith.mulf %241, %242 : vector<4x256xf32>
    %244 = arith.addf %238, %243 : vector<4x256xf32>
    %cst_14 = arith.constant 0.000000e+00 : f32
    %245 = vector.broadcast %cst_14 : f32 to vector<4x17xf32>
    %246 = vector.extract_strided_slice %4 {offsets = [0, 17], sizes = [4, 239], strides = [1, 1]} : vector<4x256xf32> to vector<4x239xf32>
    %247 = tpu.concatenate %246, %245 in 1 : vector<4x239xf32>, vector<4x17xf32> -> vector<4x256xf32>
    %248 = vector.extract_strided_slice %6 {offsets = [8, 0], sizes = [1, 256], strides = [1, 1]} : vector<9x256xf32> to vector<1x256xf32>
    %249 = vector.broadcast %248 : vector<1x256xf32> to vector<4x256xf32>
    %250 = arith.mulf %247, %249 : vector<4x256xf32>
    %251 = vector.extract_strided_slice %5 {offsets = [0, 8], sizes = [4, 1], strides = [1, 1]} : vector<4x36xf32> to vector<4x1xf32>
    %252 = vector.extract_strided_slice %250 {offsets = [0, 0], sizes = [1, 256], strides = [1, 1]} : vector<4x256xf32> to vector<1x256xf32>
    %253 = vector.broadcast %251 : vector<4x1xf32> to vector<4x256xf32>
    %254 = vector.broadcast %252 : vector<1x256xf32> to vector<4x256xf32>
    %255 = arith.mulf %253, %254 : vector<4x256xf32>
    %256 = arith.addf %244, %255 : vector<4x256xf32>
    %257 = vector.extract_strided_slice %5 {offsets = [0, 17], sizes = [4, 1], strides = [1, 1]} : vector<4x36xf32> to vector<4x1xf32>
    %258 = vector.extract_strided_slice %250 {offsets = [1, 0], sizes = [1, 256], strides = [1, 1]} : vector<4x256xf32> to vector<1x256xf32>
    %259 = vector.broadcast %257 : vector<4x1xf32> to vector<4x256xf32>
    %260 = vector.broadcast %258 : vector<1x256xf32> to vector<4x256xf32>
    %261 = arith.mulf %259, %260 : vector<4x256xf32>
    %262 = arith.addf %256, %261 : vector<4x256xf32>
    %263 = vector.extract_strided_slice %5 {offsets = [0, 26], sizes = [4, 1], strides = [1, 1]} : vector<4x36xf32> to vector<4x1xf32>
    %264 = vector.extract_strided_slice %250 {offsets = [2, 0], sizes = [1, 256], strides = [1, 1]} : vector<4x256xf32> to vector<1x256xf32>
    %265 = vector.broadcast %263 : vector<4x1xf32> to vector<4x256xf32>
    %266 = vector.broadcast %264 : vector<1x256xf32> to vector<4x256xf32>
    %267 = arith.mulf %265, %266 : vector<4x256xf32>
    %268 = arith.addf %262, %267 : vector<4x256xf32>
    %269 = vector.extract_strided_slice %5 {offsets = [0, 35], sizes = [4, 1], strides = [1, 1]} : vector<4x36xf32> to vector<4x1xf32>
    %270 = vector.extract_strided_slice %250 {offsets = [3, 0], sizes = [1, 256], strides = [1, 1]} : vector<4x256xf32> to vector<1x256xf32>
    %271 = vector.broadcast %269 : vector<4x1xf32> to vector<4x256xf32>
    %272 = vector.broadcast %270 : vector<1x256xf32> to vector<4x256xf32>
    %273 = arith.mulf %271, %272 : vector<4x256xf32>
    %274 = arith.addf %268, %273 : vector<4x256xf32>
    %c0_15 = arith.constant 0 : index
    %c0_16 = arith.constant 0 : index
    %275 = vector.load %arg4[%c0_15, %c0_16] : memref<4x1xf32, #tpu.memory_space<vmem>>, vector<4x1xf32>
    %cst_17 = arith.constant dense<0.000000e+00> : vector<4xf32>
    %276 = vector.multi_reduction <add>, %274, %cst_17 [1] : vector<4x256xf32> to vector<4xf32>
    %277 = vector.shape_cast %276 : vector<4xf32> to vector<4x1xf32>
    %278 = arith.addf %275, %277 : vector<4x1xf32>
    %c0_18 = arith.constant 0 : index
    %c0_19 = arith.constant 0 : index
    %279 = vector.load %arg4[%c0_18, %c0_19] : memref<4x1xf32, #tpu.memory_space<vmem>>, vector<4x1xf32>
    tpu.vector_store %arg4[%c0_18, %c0_19], %278 {strides = array<i32>} : memref<4x1xf32, #tpu.memory_space<vmem>>, vector<4x1xf32>,
    %c0_20 = arith.constant 0 : index
    %c0_21 = arith.constant 0 : index
    %280 = vector.load %arg5[%c0_20, %c0_21] : memref<4x1xf32, #tpu.memory_space<vmem>>, vector<4x1xf32>
    %281 = arith.mulf %274, %274 : vector<4x256xf32>
    %cst_22 = arith.constant dense<0.000000e+00> : vector<4xf32>
    %282 = vector.multi_reduction <add>, %281, %cst_22 [1] : vector<4x256xf32> to vector<4xf32>
    %283 = vector.shape_cast %282 : vector<4xf32> to vector<4x1xf32>
    %284 = arith.addf %280, %283 : vector<4x1xf32>
    %c0_23 = arith.constant 0 : index
    %c0_24 = arith.constant 0 : index
    %285 = vector.load %arg5[%c0_23, %c0_24] : memref<4x1xf32, #tpu.memory_space<vmem>>, vector<4x1xf32>
    tpu.vector_store %arg5[%c0_23, %c0_24], %284 {strides = array<i32>} : memref<4x1xf32, #tpu.memory_space<vmem>>, vector<4x1xf32>,
    return
  }
  func.func @transform_0(%arg0: i32) -> (i32, i32, i32) {
    %c0_i32 = arith.constant 0 : i32
    %c0_i32_0 = arith.constant 0 : i32
    %c0_i32_1 = arith.constant 0 : i32
    return %arg0, %c0_i32, %c0_i32_0 : i32, i32, i32
  }
  func.func @transform_1(%arg0: i32) -> (i32, i32) {
    %c0_i32 = arith.constant 0 : i32
    %c0_i32_0 = arith.constant 0 : i32
    %c0_i32_1 = arith.constant 0 : i32
    return %c0_i32, %c0_i32_0 : i32, i32
  }
  func.func @transform_2(%arg0: i32) -> (i32, i32) {
    %c0_i32 = arith.constant 0 : i32
    %c0_i32_0 = arith.constant 0 : i32
    %c0_i32_1 = arith.constant 0 : i32
    return %c0_i32, %c0_i32_0 : i32, i32
  }
  func.func @transform_3(%arg0: i32) -> (i32, i32) {
    %c0_i32 = arith.constant 0 : i32
    %c0_i32_0 = arith.constant 0 : i32
    %c0_i32_1 = arith.constant 0 : i32
    return %c0_i32, %c0_i32_0 : i32, i32
  }
  func.func @transform_4(%arg0: i32) -> (i32, i32) {
    %c0_i32 = arith.constant 0 : i32
    %c0_i32_0 = arith.constant 0 : i32
    %c0_i32_1 = arith.constant 0 : i32
    return %c0_i32, %c0_i32_0 : i32, i32
  }
}

module attributes {stable_mosaic.version = 11 : i64} {
  func.func @_apply_kernel(%arg0: i32, %arg1: memref<1x4x256xf32, #tpu.memory_space<vmem>>, %arg2: memref<4x36xf32, #tpu.memory_space<vmem>>, %arg3: memref<9x256xf32, #tpu.memory_space<vmem>>, %arg4: memref<4x1xf32, #tpu.memory_space<vmem>>, %arg5: memref<4x1xf32, #tpu.memory_space<vmem>>, %arg6: memref<4x1xf32, #tpu.memory_space<vmem>>, %arg7: memref<4x1xf32, #tpu.memory_space<vmem>>, %arg8: memref<1x4x256xf32, #tpu.memory_space<vmem>>) attributes {dimension_semantics = [#tpu.dimension_semantics<parallel>], iteration_bounds = array<i64: 2>, scalar_prefetch = 0 : i64, scratch_operands = 0 : i64, tpu.core_type = #tpu.core_type<tc>, window_params = [{transform_indices = @transform_0, window_bounds = array<i64: 1, 4, 256>}, {pipeline_mode = #tpu.pipeline_mode<synchronous>, transform_indices = @transform_1, window_bounds = array<i64: 4, 36>}, {pipeline_mode = #tpu.pipeline_mode<synchronous>, transform_indices = @transform_2, window_bounds = array<i64: 9, 256>}, {pipeline_mode = #tpu.pipeline_mode<synchronous>, transform_indices = @transform_3, window_bounds = array<i64: 4, 1>}, {pipeline_mode = #tpu.pipeline_mode<synchronous>, transform_indices = @transform_4, window_bounds = array<i64: 4, 1>}, {pipeline_mode = #tpu.pipeline_mode<synchronous>, transform_indices = @transform_5, window_bounds = array<i64: 4, 1>}, {pipeline_mode = #tpu.pipeline_mode<synchronous>, transform_indices = @transform_6, window_bounds = array<i64: 4, 1>}, {transform_indices = @transform_7, window_bounds = array<i64: 1, 4, 256>}]} {
    %c0 = arith.constant 0 : index
    %c0_0 = arith.constant 0 : index
    %c0_1 = arith.constant 0 : index
    %0 = vector.load %arg1[%c0, %c0_0, %c0_1] : memref<1x4x256xf32, #tpu.memory_space<vmem>>, vector<1x4x256xf32>
    %1 = vector.shape_cast %0 : vector<1x4x256xf32> to vector<4x256xf32>
    %c0_2 = arith.constant 0 : index
    %c0_3 = arith.constant 0 : index
    %2 = vector.load %arg2[%c0_2, %c0_3] : memref<4x36xf32, #tpu.memory_space<vmem>>, vector<4x36xf32>
    %c0_4 = arith.constant 0 : index
    %c0_5 = arith.constant 0 : index
    %3 = vector.load %arg3[%c0_4, %c0_5] : memref<9x256xf32, #tpu.memory_space<vmem>>, vector<9x256xf32>
    %cst = arith.constant 0.000000e+00 : f32
    %4 = vector.broadcast %cst : f32 to vector<4x256xf32>
    %cst_6 = arith.constant 0.000000e+00 : f32
    %5 = vector.broadcast %cst_6 : f32 to vector<4x17xf32>
    %6 = vector.extract_strided_slice %1 {offsets = [0, 0], sizes = [4, 239], strides = [1, 1]} : vector<4x256xf32> to vector<4x239xf32>
    %7 = tpu.concatenate %5, %6 in 1 : vector<4x17xf32>, vector<4x239xf32> -> vector<4x256xf32>
    %8 = vector.extract_strided_slice %3 {offsets = [0, 0], sizes = [1, 256], strides = [1, 1]} : vector<9x256xf32> to vector<1x256xf32>
    %9 = vector.broadcast %8 : vector<1x256xf32> to vector<4x256xf32>
    %10 = arith.mulf %7, %9 : vector<4x256xf32>
    %11 = vector.extract_strided_slice %2 {offsets = [0, 0], sizes = [4, 1], strides = [1, 1]} : vector<4x36xf32> to vector<4x1xf32>
    %12 = vector.extract_strided_slice %10 {offsets = [0, 0], sizes = [1, 256], strides = [1, 1]} : vector<4x256xf32> to vector<1x256xf32>
    %13 = vector.broadcast %11 : vector<4x1xf32> to vector<4x256xf32>
    %14 = vector.broadcast %12 : vector<1x256xf32> to vector<4x256xf32>
    %15 = arith.mulf %13, %14 : vector<4x256xf32>
    %16 = arith.addf %4, %15 : vector<4x256xf32>
    %17 = vector.extract_strided_slice %2 {offsets = [0, 9], sizes = [4, 1], strides = [1, 1]} : vector<4x36xf32> to vector<4x1xf32>
    %18 = vector.extract_strided_slice %10 {offsets = [1, 0], sizes = [1, 256], strides = [1, 1]} : vector<4x256xf32> to vector<1x256xf32>
    %19 = vector.broadcast %17 : vector<4x1xf32> to vector<4x256xf32>
    %20 = vector.broadcast %18 : vector<1x256xf32> to vector<4x256xf32>
    %21 = arith.mulf %19, %20 : vector<4x256xf32>
    %22 = arith.addf %16, %21 : vector<4x256xf32>
    %23 = vector.extract_strided_slice %2 {offsets = [0, 18], sizes = [4, 1], strides = [1, 1]} : vector<4x36xf32> to vector<4x1xf32>
    %24 = vector.extract_strided_slice %10 {offsets = [2, 0], sizes = [1, 256], strides = [1, 1]} : vector<4x256xf32> to vector<1x256xf32>
    %25 = vector.broadcast %23 : vector<4x1xf32> to vector<4x256xf32>
    %26 = vector.broadcast %24 : vector<1x256xf32> to vector<4x256xf32>
    %27 = arith.mulf %25, %26 : vector<4x256xf32>
    %28 = arith.addf %22, %27 : vector<4x256xf32>
    %29 = vector.extract_strided_slice %2 {offsets = [0, 27], sizes = [4, 1], strides = [1, 1]} : vector<4x36xf32> to vector<4x1xf32>
    %30 = vector.extract_strided_slice %10 {offsets = [3, 0], sizes = [1, 256], strides = [1, 1]} : vector<4x256xf32> to vector<1x256xf32>
    %31 = vector.broadcast %29 : vector<4x1xf32> to vector<4x256xf32>
    %32 = vector.broadcast %30 : vector<1x256xf32> to vector<4x256xf32>
    %33 = arith.mulf %31, %32 : vector<4x256xf32>
    %34 = arith.addf %28, %33 : vector<4x256xf32>
    %cst_7 = arith.constant 0.000000e+00 : f32
    %35 = vector.broadcast %cst_7 : f32 to vector<4x16xf32>
    %36 = vector.extract_strided_slice %1 {offsets = [0, 0], sizes = [4, 240], strides = [1, 1]} : vector<4x256xf32> to vector<4x240xf32>
    %37 = tpu.concatenate %35, %36 in 1 : vector<4x16xf32>, vector<4x240xf32> -> vector<4x256xf32>
    %38 = vector.extract_strided_slice %3 {offsets = [1, 0], sizes = [1, 256], strides = [1, 1]} : vector<9x256xf32> to vector<1x256xf32>
    %39 = vector.broadcast %38 : vector<1x256xf32> to vector<4x256xf32>
    %40 = arith.mulf %37, %39 : vector<4x256xf32>
    %41 = vector.extract_strided_slice %2 {offsets = [0, 1], sizes = [4, 1], strides = [1, 1]} : vector<4x36xf32> to vector<4x1xf32>
    %42 = vector.extract_strided_slice %40 {offsets = [0, 0], sizes = [1, 256], strides = [1, 1]} : vector<4x256xf32> to vector<1x256xf32>
    %43 = vector.broadcast %41 : vector<4x1xf32> to vector<4x256xf32>
    %44 = vector.broadcast %42 : vector<1x256xf32> to vector<4x256xf32>
    %45 = arith.mulf %43, %44 : vector<4x256xf32>
    %46 = arith.addf %34, %45 : vector<4x256xf32>
    %47 = vector.extract_strided_slice %2 {offsets = [0, 10], sizes = [4, 1], strides = [1, 1]} : vector<4x36xf32> to vector<4x1xf32>
    %48 = vector.extract_strided_slice %40 {offsets = [1, 0], sizes = [1, 256], strides = [1, 1]} : vector<4x256xf32> to vector<1x256xf32>
    %49 = vector.broadcast %47 : vector<4x1xf32> to vector<4x256xf32>
    %50 = vector.broadcast %48 : vector<1x256xf32> to vector<4x256xf32>
    %51 = arith.mulf %49, %50 : vector<4x256xf32>
    %52 = arith.addf %46, %51 : vector<4x256xf32>
    %53 = vector.extract_strided_slice %2 {offsets = [0, 19], sizes = [4, 1], strides = [1, 1]} : vector<4x36xf32> to vector<4x1xf32>
    %54 = vector.extract_strided_slice %40 {offsets = [2, 0], sizes = [1, 256], strides = [1, 1]} : vector<4x256xf32> to vector<1x256xf32>
    %55 = vector.broadcast %53 : vector<4x1xf32> to vector<4x256xf32>
    %56 = vector.broadcast %54 : vector<1x256xf32> to vector<4x256xf32>
    %57 = arith.mulf %55, %56 : vector<4x256xf32>
    %58 = arith.addf %52, %57 : vector<4x256xf32>
    %59 = vector.extract_strided_slice %2 {offsets = [0, 28], sizes = [4, 1], strides = [1, 1]} : vector<4x36xf32> to vector<4x1xf32>
    %60 = vector.extract_strided_slice %40 {offsets = [3, 0], sizes = [1, 256], strides = [1, 1]} : vector<4x256xf32> to vector<1x256xf32>
    %61 = vector.broadcast %59 : vector<4x1xf32> to vector<4x256xf32>
    %62 = vector.broadcast %60 : vector<1x256xf32> to vector<4x256xf32>
    %63 = arith.mulf %61, %62 : vector<4x256xf32>
    %64 = arith.addf %58, %63 : vector<4x256xf32>
    %cst_8 = arith.constant 0.000000e+00 : f32
    %65 = vector.broadcast %cst_8 : f32 to vector<4x15xf32>
    %66 = vector.extract_strided_slice %1 {offsets = [0, 0], sizes = [4, 241], strides = [1, 1]} : vector<4x256xf32> to vector<4x241xf32>
    %67 = tpu.concatenate %65, %66 in 1 : vector<4x15xf32>, vector<4x241xf32> -> vector<4x256xf32>
    %68 = vector.extract_strided_slice %3 {offsets = [2, 0], sizes = [1, 256], strides = [1, 1]} : vector<9x256xf32> to vector<1x256xf32>
    %69 = vector.broadcast %68 : vector<1x256xf32> to vector<4x256xf32>
    %70 = arith.mulf %67, %69 : vector<4x256xf32>
    %71 = vector.extract_strided_slice %2 {offsets = [0, 2], sizes = [4, 1], strides = [1, 1]} : vector<4x36xf32> to vector<4x1xf32>
    %72 = vector.extract_strided_slice %70 {offsets = [0, 0], sizes = [1, 256], strides = [1, 1]} : vector<4x256xf32> to vector<1x256xf32>
    %73 = vector.broadcast %71 : vector<4x1xf32> to vector<4x256xf32>
    %74 = vector.broadcast %72 : vector<1x256xf32> to vector<4x256xf32>
    %75 = arith.mulf %73, %74 : vector<4x256xf32>
    %76 = arith.addf %64, %75 : vector<4x256xf32>
    %77 = vector.extract_strided_slice %2 {offsets = [0, 11], sizes = [4, 1], strides = [1, 1]} : vector<4x36xf32> to vector<4x1xf32>
    %78 = vector.extract_strided_slice %70 {offsets = [1, 0], sizes = [1, 256], strides = [1, 1]} : vector<4x256xf32> to vector<1x256xf32>
    %79 = vector.broadcast %77 : vector<4x1xf32> to vector<4x256xf32>
    %80 = vector.broadcast %78 : vector<1x256xf32> to vector<4x256xf32>
    %81 = arith.mulf %79, %80 : vector<4x256xf32>
    %82 = arith.addf %76, %81 : vector<4x256xf32>
    %83 = vector.extract_strided_slice %2 {offsets = [0, 20], sizes = [4, 1], strides = [1, 1]} : vector<4x36xf32> to vector<4x1xf32>
    %84 = vector.extract_strided_slice %70 {offsets = [2, 0], sizes = [1, 256], strides = [1, 1]} : vector<4x256xf32> to vector<1x256xf32>
    %85 = vector.broadcast %83 : vector<4x1xf32> to vector<4x256xf32>
    %86 = vector.broadcast %84 : vector<1x256xf32> to vector<4x256xf32>
    %87 = arith.mulf %85, %86 : vector<4x256xf32>
    %88 = arith.addf %82, %87 : vector<4x256xf32>
    %89 = vector.extract_strided_slice %2 {offsets = [0, 29], sizes = [4, 1], strides = [1, 1]} : vector<4x36xf32> to vector<4x1xf32>
    %90 = vector.extract_strided_slice %70 {offsets = [3, 0], sizes = [1, 256], strides = [1, 1]} : vector<4x256xf32> to vector<1x256xf32>
    %91 = vector.broadcast %89 : vector<4x1xf32> to vector<4x256xf32>
    %92 = vector.broadcast %90 : vector<1x256xf32> to vector<4x256xf32>
    %93 = arith.mulf %91, %92 : vector<4x256xf32>
    %94 = arith.addf %88, %93 : vector<4x256xf32>
    %cst_9 = arith.constant 0.000000e+00 : f32
    %95 = vector.broadcast %cst_9 : f32 to vector<4x1xf32>
    %96 = vector.extract_strided_slice %1 {offsets = [0, 0], sizes = [4, 255], strides = [1, 1]} : vector<4x256xf32> to vector<4x255xf32>
    %97 = tpu.concatenate %95, %96 in 1 : vector<4x1xf32>, vector<4x255xf32> -> vector<4x256xf32>
    %98 = vector.extract_strided_slice %3 {offsets = [3, 0], sizes = [1, 256], strides = [1, 1]} : vector<9x256xf32> to vector<1x256xf32>
    %99 = vector.broadcast %98 : vector<1x256xf32> to vector<4x256xf32>
    %100 = arith.mulf %97, %99 : vector<4x256xf32>
    %101 = vector.extract_strided_slice %2 {offsets = [0, 3], sizes = [4, 1], strides = [1, 1]} : vector<4x36xf32> to vector<4x1xf32>
    %102 = vector.extract_strided_slice %100 {offsets = [0, 0], sizes = [1, 256], strides = [1, 1]} : vector<4x256xf32> to vector<1x256xf32>
    %103 = vector.broadcast %101 : vector<4x1xf32> to vector<4x256xf32>
    %104 = vector.broadcast %102 : vector<1x256xf32> to vector<4x256xf32>
    %105 = arith.mulf %103, %104 : vector<4x256xf32>
    %106 = arith.addf %94, %105 : vector<4x256xf32>
    %107 = vector.extract_strided_slice %2 {offsets = [0, 12], sizes = [4, 1], strides = [1, 1]} : vector<4x36xf32> to vector<4x1xf32>
    %108 = vector.extract_strided_slice %100 {offsets = [1, 0], sizes = [1, 256], strides = [1, 1]} : vector<4x256xf32> to vector<1x256xf32>
    %109 = vector.broadcast %107 : vector<4x1xf32> to vector<4x256xf32>
    %110 = vector.broadcast %108 : vector<1x256xf32> to vector<4x256xf32>
    %111 = arith.mulf %109, %110 : vector<4x256xf32>
    %112 = arith.addf %106, %111 : vector<4x256xf32>
    %113 = vector.extract_strided_slice %2 {offsets = [0, 21], sizes = [4, 1], strides = [1, 1]} : vector<4x36xf32> to vector<4x1xf32>
    %114 = vector.extract_strided_slice %100 {offsets = [2, 0], sizes = [1, 256], strides = [1, 1]} : vector<4x256xf32> to vector<1x256xf32>
    %115 = vector.broadcast %113 : vector<4x1xf32> to vector<4x256xf32>
    %116 = vector.broadcast %114 : vector<1x256xf32> to vector<4x256xf32>
    %117 = arith.mulf %115, %116 : vector<4x256xf32>
    %118 = arith.addf %112, %117 : vector<4x256xf32>
    %119 = vector.extract_strided_slice %2 {offsets = [0, 30], sizes = [4, 1], strides = [1, 1]} : vector<4x36xf32> to vector<4x1xf32>
    %120 = vector.extract_strided_slice %100 {offsets = [3, 0], sizes = [1, 256], strides = [1, 1]} : vector<4x256xf32> to vector<1x256xf32>
    %121 = vector.broadcast %119 : vector<4x1xf32> to vector<4x256xf32>
    %122 = vector.broadcast %120 : vector<1x256xf32> to vector<4x256xf32>
    %123 = arith.mulf %121, %122 : vector<4x256xf32>
    %124 = arith.addf %118, %123 : vector<4x256xf32>
    %125 = vector.extract_strided_slice %3 {offsets = [4, 0], sizes = [1, 256], strides = [1, 1]} : vector<9x256xf32> to vector<1x256xf32>
    %126 = vector.broadcast %125 : vector<1x256xf32> to vector<4x256xf32>
    %127 = arith.mulf %1, %126 : vector<4x256xf32>
    %128 = vector.extract_strided_slice %2 {offsets = [0, 4], sizes = [4, 1], strides = [1, 1]} : vector<4x36xf32> to vector<4x1xf32>
    %129 = vector.extract_strided_slice %127 {offsets = [0, 0], sizes = [1, 256], strides = [1, 1]} : vector<4x256xf32> to vector<1x256xf32>
    %130 = vector.broadcast %128 : vector<4x1xf32> to vector<4x256xf32>
    %131 = vector.broadcast %129 : vector<1x256xf32> to vector<4x256xf32>
    %132 = arith.mulf %130, %131 : vector<4x256xf32>
    %133 = arith.addf %124, %132 : vector<4x256xf32>
    %134 = vector.extract_strided_slice %2 {offsets = [0, 13], sizes = [4, 1], strides = [1, 1]} : vector<4x36xf32> to vector<4x1xf32>
    %135 = vector.extract_strided_slice %127 {offsets = [1, 0], sizes = [1, 256], strides = [1, 1]} : vector<4x256xf32> to vector<1x256xf32>
    %136 = vector.broadcast %134 : vector<4x1xf32> to vector<4x256xf32>
    %137 = vector.broadcast %135 : vector<1x256xf32> to vector<4x256xf32>
    %138 = arith.mulf %136, %137 : vector<4x256xf32>
    %139 = arith.addf %133, %138 : vector<4x256xf32>
    %140 = vector.extract_strided_slice %2 {offsets = [0, 22], sizes = [4, 1], strides = [1, 1]} : vector<4x36xf32> to vector<4x1xf32>
    %141 = vector.extract_strided_slice %127 {offsets = [2, 0], sizes = [1, 256], strides = [1, 1]} : vector<4x256xf32> to vector<1x256xf32>
    %142 = vector.broadcast %140 : vector<4x1xf32> to vector<4x256xf32>
    %143 = vector.broadcast %141 : vector<1x256xf32> to vector<4x256xf32>
    %144 = arith.mulf %142, %143 : vector<4x256xf32>
    %145 = arith.addf %139, %144 : vector<4x256xf32>
    %146 = vector.extract_strided_slice %2 {offsets = [0, 31], sizes = [4, 1], strides = [1, 1]} : vector<4x36xf32> to vector<4x1xf32>
    %147 = vector.extract_strided_slice %127 {offsets = [3, 0], sizes = [1, 256], strides = [1, 1]} : vector<4x256xf32> to vector<1x256xf32>
    %148 = vector.broadcast %146 : vector<4x1xf32> to vector<4x256xf32>
    %149 = vector.broadcast %147 : vector<1x256xf32> to vector<4x256xf32>
    %150 = arith.mulf %148, %149 : vector<4x256xf32>
    %151 = arith.addf %145, %150 : vector<4x256xf32>
    %cst_10 = arith.constant 0.000000e+00 : f32
    %152 = vector.broadcast %cst_10 : f32 to vector<4x1xf32>
    %153 = vector.extract_strided_slice %1 {offsets = [0, 1], sizes = [4, 255], strides = [1, 1]} : vector<4x256xf32> to vector<4x255xf32>
    %154 = tpu.concatenate %153, %152 in 1 : vector<4x255xf32>, vector<4x1xf32> -> vector<4x256xf32>
    %155 = vector.extract_strided_slice %3 {offsets = [5, 0], sizes = [1, 256], strides = [1, 1]} : vector<9x256xf32> to vector<1x256xf32>
    %156 = vector.broadcast %155 : vector<1x256xf32> to vector<4x256xf32>
    %157 = arith.mulf %154, %156 : vector<4x256xf32>
    %158 = vector.extract_strided_slice %2 {offsets = [0, 5], sizes = [4, 1], strides = [1, 1]} : vector<4x36xf32> to vector<4x1xf32>
    %159 = vector.extract_strided_slice %157 {offsets = [0, 0], sizes = [1, 256], strides = [1, 1]} : vector<4x256xf32> to vector<1x256xf32>
    %160 = vector.broadcast %158 : vector<4x1xf32> to vector<4x256xf32>
    %161 = vector.broadcast %159 : vector<1x256xf32> to vector<4x256xf32>
    %162 = arith.mulf %160, %161 : vector<4x256xf32>
    %163 = arith.addf %151, %162 : vector<4x256xf32>
    %164 = vector.extract_strided_slice %2 {offsets = [0, 14], sizes = [4, 1], strides = [1, 1]} : vector<4x36xf32> to vector<4x1xf32>
    %165 = vector.extract_strided_slice %157 {offsets = [1, 0], sizes = [1, 256], strides = [1, 1]} : vector<4x256xf32> to vector<1x256xf32>
    %166 = vector.broadcast %164 : vector<4x1xf32> to vector<4x256xf32>
    %167 = vector.broadcast %165 : vector<1x256xf32> to vector<4x256xf32>
    %168 = arith.mulf %166, %167 : vector<4x256xf32>
    %169 = arith.addf %163, %168 : vector<4x256xf32>
    %170 = vector.extract_strided_slice %2 {offsets = [0, 23], sizes = [4, 1], strides = [1, 1]} : vector<4x36xf32> to vector<4x1xf32>
    %171 = vector.extract_strided_slice %157 {offsets = [2, 0], sizes = [1, 256], strides = [1, 1]} : vector<4x256xf32> to vector<1x256xf32>
    %172 = vector.broadcast %170 : vector<4x1xf32> to vector<4x256xf32>
    %173 = vector.broadcast %171 : vector<1x256xf32> to vector<4x256xf32>
    %174 = arith.mulf %172, %173 : vector<4x256xf32>
    %175 = arith.addf %169, %174 : vector<4x256xf32>
    %176 = vector.extract_strided_slice %2 {offsets = [0, 32], sizes = [4, 1], strides = [1, 1]} : vector<4x36xf32> to vector<4x1xf32>
    %177 = vector.extract_strided_slice %157 {offsets = [3, 0], sizes = [1, 256], strides = [1, 1]} : vector<4x256xf32> to vector<1x256xf32>
    %178 = vector.broadcast %176 : vector<4x1xf32> to vector<4x256xf32>
    %179 = vector.broadcast %177 : vector<1x256xf32> to vector<4x256xf32>
    %180 = arith.mulf %178, %179 : vector<4x256xf32>
    %181 = arith.addf %175, %180 : vector<4x256xf32>
    %cst_11 = arith.constant 0.000000e+00 : f32
    %182 = vector.broadcast %cst_11 : f32 to vector<4x15xf32>
    %183 = vector.extract_strided_slice %1 {offsets = [0, 15], sizes = [4, 241], strides = [1, 1]} : vector<4x256xf32> to vector<4x241xf32>
    %184 = tpu.concatenate %183, %182 in 1 : vector<4x241xf32>, vector<4x15xf32> -> vector<4x256xf32>
    %185 = vector.extract_strided_slice %3 {offsets = [6, 0], sizes = [1, 256], strides = [1, 1]} : vector<9x256xf32> to vector<1x256xf32>
    %186 = vector.broadcast %185 : vector<1x256xf32> to vector<4x256xf32>
    %187 = arith.mulf %184, %186 : vector<4x256xf32>
    %188 = vector.extract_strided_slice %2 {offsets = [0, 6], sizes = [4, 1], strides = [1, 1]} : vector<4x36xf32> to vector<4x1xf32>
    %189 = vector.extract_strided_slice %187 {offsets = [0, 0], sizes = [1, 256], strides = [1, 1]} : vector<4x256xf32> to vector<1x256xf32>
    %190 = vector.broadcast %188 : vector<4x1xf32> to vector<4x256xf32>
    %191 = vector.broadcast %189 : vector<1x256xf32> to vector<4x256xf32>
    %192 = arith.mulf %190, %191 : vector<4x256xf32>
    %193 = arith.addf %181, %192 : vector<4x256xf32>
    %194 = vector.extract_strided_slice %2 {offsets = [0, 15], sizes = [4, 1], strides = [1, 1]} : vector<4x36xf32> to vector<4x1xf32>
    %195 = vector.extract_strided_slice %187 {offsets = [1, 0], sizes = [1, 256], strides = [1, 1]} : vector<4x256xf32> to vector<1x256xf32>
    %196 = vector.broadcast %194 : vector<4x1xf32> to vector<4x256xf32>
    %197 = vector.broadcast %195 : vector<1x256xf32> to vector<4x256xf32>
    %198 = arith.mulf %196, %197 : vector<4x256xf32>
    %199 = arith.addf %193, %198 : vector<4x256xf32>
    %200 = vector.extract_strided_slice %2 {offsets = [0, 24], sizes = [4, 1], strides = [1, 1]} : vector<4x36xf32> to vector<4x1xf32>
    %201 = vector.extract_strided_slice %187 {offsets = [2, 0], sizes = [1, 256], strides = [1, 1]} : vector<4x256xf32> to vector<1x256xf32>
    %202 = vector.broadcast %200 : vector<4x1xf32> to vector<4x256xf32>
    %203 = vector.broadcast %201 : vector<1x256xf32> to vector<4x256xf32>
    %204 = arith.mulf %202, %203 : vector<4x256xf32>
    %205 = arith.addf %199, %204 : vector<4x256xf32>
    %206 = vector.extract_strided_slice %2 {offsets = [0, 33], sizes = [4, 1], strides = [1, 1]} : vector<4x36xf32> to vector<4x1xf32>
    %207 = vector.extract_strided_slice %187 {offsets = [3, 0], sizes = [1, 256], strides = [1, 1]} : vector<4x256xf32> to vector<1x256xf32>
    %208 = vector.broadcast %206 : vector<4x1xf32> to vector<4x256xf32>
    %209 = vector.broadcast %207 : vector<1x256xf32> to vector<4x256xf32>
    %210 = arith.mulf %208, %209 : vector<4x256xf32>
    %211 = arith.addf %205, %210 : vector<4x256xf32>
    %cst_12 = arith.constant 0.000000e+00 : f32
    %212 = vector.broadcast %cst_12 : f32 to vector<4x16xf32>
    %213 = vector.extract_strided_slice %1 {offsets = [0, 16], sizes = [4, 240], strides = [1, 1]} : vector<4x256xf32> to vector<4x240xf32>
    %214 = tpu.concatenate %213, %212 in 1 : vector<4x240xf32>, vector<4x16xf32> -> vector<4x256xf32>
    %215 = vector.extract_strided_slice %3 {offsets = [7, 0], sizes = [1, 256], strides = [1, 1]} : vector<9x256xf32> to vector<1x256xf32>
    %216 = vector.broadcast %215 : vector<1x256xf32> to vector<4x256xf32>
    %217 = arith.mulf %214, %216 : vector<4x256xf32>
    %218 = vector.extract_strided_slice %2 {offsets = [0, 7], sizes = [4, 1], strides = [1, 1]} : vector<4x36xf32> to vector<4x1xf32>
    %219 = vector.extract_strided_slice %217 {offsets = [0, 0], sizes = [1, 256], strides = [1, 1]} : vector<4x256xf32> to vector<1x256xf32>
    %220 = vector.broadcast %218 : vector<4x1xf32> to vector<4x256xf32>
    %221 = vector.broadcast %219 : vector<1x256xf32> to vector<4x256xf32>
    %222 = arith.mulf %220, %221 : vector<4x256xf32>
    %223 = arith.addf %211, %222 : vector<4x256xf32>
    %224 = vector.extract_strided_slice %2 {offsets = [0, 16], sizes = [4, 1], strides = [1, 1]} : vector<4x36xf32> to vector<4x1xf32>
    %225 = vector.extract_strided_slice %217 {offsets = [1, 0], sizes = [1, 256], strides = [1, 1]} : vector<4x256xf32> to vector<1x256xf32>
    %226 = vector.broadcast %224 : vector<4x1xf32> to vector<4x256xf32>
    %227 = vector.broadcast %225 : vector<1x256xf32> to vector<4x256xf32>
    %228 = arith.mulf %226, %227 : vector<4x256xf32>
    %229 = arith.addf %223, %228 : vector<4x256xf32>
    %230 = vector.extract_strided_slice %2 {offsets = [0, 25], sizes = [4, 1], strides = [1, 1]} : vector<4x36xf32> to vector<4x1xf32>
    %231 = vector.extract_strided_slice %217 {offsets = [2, 0], sizes = [1, 256], strides = [1, 1]} : vector<4x256xf32> to vector<1x256xf32>
    %232 = vector.broadcast %230 : vector<4x1xf32> to vector<4x256xf32>
    %233 = vector.broadcast %231 : vector<1x256xf32> to vector<4x256xf32>
    %234 = arith.mulf %232, %233 : vector<4x256xf32>
    %235 = arith.addf %229, %234 : vector<4x256xf32>
    %236 = vector.extract_strided_slice %2 {offsets = [0, 34], sizes = [4, 1], strides = [1, 1]} : vector<4x36xf32> to vector<4x1xf32>
    %237 = vector.extract_strided_slice %217 {offsets = [3, 0], sizes = [1, 256], strides = [1, 1]} : vector<4x256xf32> to vector<1x256xf32>
    %238 = vector.broadcast %236 : vector<4x1xf32> to vector<4x256xf32>
    %239 = vector.broadcast %237 : vector<1x256xf32> to vector<4x256xf32>
    %240 = arith.mulf %238, %239 : vector<4x256xf32>
    %241 = arith.addf %235, %240 : vector<4x256xf32>
    %cst_13 = arith.constant 0.000000e+00 : f32
    %242 = vector.broadcast %cst_13 : f32 to vector<4x17xf32>
    %243 = vector.extract_strided_slice %1 {offsets = [0, 17], sizes = [4, 239], strides = [1, 1]} : vector<4x256xf32> to vector<4x239xf32>
    %244 = tpu.concatenate %243, %242 in 1 : vector<4x239xf32>, vector<4x17xf32> -> vector<4x256xf32>
    %245 = vector.extract_strided_slice %3 {offsets = [8, 0], sizes = [1, 256], strides = [1, 1]} : vector<9x256xf32> to vector<1x256xf32>
    %246 = vector.broadcast %245 : vector<1x256xf32> to vector<4x256xf32>
    %247 = arith.mulf %244, %246 : vector<4x256xf32>
    %248 = vector.extract_strided_slice %2 {offsets = [0, 8], sizes = [4, 1], strides = [1, 1]} : vector<4x36xf32> to vector<4x1xf32>
    %249 = vector.extract_strided_slice %247 {offsets = [0, 0], sizes = [1, 256], strides = [1, 1]} : vector<4x256xf32> to vector<1x256xf32>
    %250 = vector.broadcast %248 : vector<4x1xf32> to vector<4x256xf32>
    %251 = vector.broadcast %249 : vector<1x256xf32> to vector<4x256xf32>
    %252 = arith.mulf %250, %251 : vector<4x256xf32>
    %253 = arith.addf %241, %252 : vector<4x256xf32>
    %254 = vector.extract_strided_slice %2 {offsets = [0, 17], sizes = [4, 1], strides = [1, 1]} : vector<4x36xf32> to vector<4x1xf32>
    %255 = vector.extract_strided_slice %247 {offsets = [1, 0], sizes = [1, 256], strides = [1, 1]} : vector<4x256xf32> to vector<1x256xf32>
    %256 = vector.broadcast %254 : vector<4x1xf32> to vector<4x256xf32>
    %257 = vector.broadcast %255 : vector<1x256xf32> to vector<4x256xf32>
    %258 = arith.mulf %256, %257 : vector<4x256xf32>
    %259 = arith.addf %253, %258 : vector<4x256xf32>
    %260 = vector.extract_strided_slice %2 {offsets = [0, 26], sizes = [4, 1], strides = [1, 1]} : vector<4x36xf32> to vector<4x1xf32>
    %261 = vector.extract_strided_slice %247 {offsets = [2, 0], sizes = [1, 256], strides = [1, 1]} : vector<4x256xf32> to vector<1x256xf32>
    %262 = vector.broadcast %260 : vector<4x1xf32> to vector<4x256xf32>
    %263 = vector.broadcast %261 : vector<1x256xf32> to vector<4x256xf32>
    %264 = arith.mulf %262, %263 : vector<4x256xf32>
    %265 = arith.addf %259, %264 : vector<4x256xf32>
    %266 = vector.extract_strided_slice %2 {offsets = [0, 35], sizes = [4, 1], strides = [1, 1]} : vector<4x36xf32> to vector<4x1xf32>
    %267 = vector.extract_strided_slice %247 {offsets = [3, 0], sizes = [1, 256], strides = [1, 1]} : vector<4x256xf32> to vector<1x256xf32>
    %268 = vector.broadcast %266 : vector<4x1xf32> to vector<4x256xf32>
    %269 = vector.broadcast %267 : vector<1x256xf32> to vector<4x256xf32>
    %270 = arith.mulf %268, %269 : vector<4x256xf32>
    %271 = arith.addf %265, %270 : vector<4x256xf32>
    %c0_14 = arith.constant 0 : index
    %c0_15 = arith.constant 0 : index
    %272 = vector.load %arg4[%c0_14, %c0_15] : memref<4x1xf32, #tpu.memory_space<vmem>>, vector<4x1xf32>
    %cst_16 = arith.constant 0.001953125 : f32
    %273 = vector.broadcast %cst_16 : f32 to vector<4x1xf32>
    %274 = arith.mulf %272, %273 : vector<4x1xf32>
    %c0_17 = arith.constant 0 : index
    %c0_18 = arith.constant 0 : index
    %275 = vector.load %arg5[%c0_17, %c0_18] : memref<4x1xf32, #tpu.memory_space<vmem>>, vector<4x1xf32>
    %cst_19 = arith.constant 0.001953125 : f32
    %276 = vector.broadcast %cst_19 : f32 to vector<4x1xf32>
    %277 = arith.mulf %275, %276 : vector<4x1xf32>
    %278 = arith.mulf %274, %274 : vector<4x1xf32>
    %279 = arith.subf %277, %278 : vector<4x1xf32>
    %cst_20 = arith.constant 9.99999974E-6 : f32
    %280 = vector.broadcast %cst_20 : f32 to vector<4x1xf32>
    %281 = arith.addf %279, %280 : vector<4x1xf32>
    %282 = math.rsqrt %281 : vector<4x1xf32>
    %c0_21 = arith.constant 0 : index
    %c0_22 = arith.constant 0 : index
    %283 = vector.load %arg6[%c0_21, %c0_22] : memref<4x1xf32, #tpu.memory_space<vmem>>, vector<4x1xf32>
    %284 = arith.mulf %283, %282 : vector<4x1xf32>
    %c0_23 = arith.constant 0 : index
    %c0_24 = arith.constant 0 : index
    %285 = vector.load %arg7[%c0_23, %c0_24] : memref<4x1xf32, #tpu.memory_space<vmem>>, vector<4x1xf32>
    %286 = arith.mulf %274, %284 : vector<4x1xf32>
    %287 = arith.subf %285, %286 : vector<4x1xf32>
    %288 = vector.broadcast %284 : vector<4x1xf32> to vector<4x256xf32>
    %289 = arith.mulf %271, %288 : vector<4x256xf32>
    %290 = vector.broadcast %287 : vector<4x1xf32> to vector<4x256xf32>
    %291 = arith.addf %289, %290 : vector<4x256xf32>
    %292 = arith.addf %291, %1 : vector<4x256xf32>
    %c0_25 = arith.constant 0 : index
    %c0_26 = arith.constant 0 : index
    %c0_27 = arith.constant 0 : index
    %293 = vector.load %arg8[%c0_25, %c0_26, %c0_27] : memref<1x4x256xf32, #tpu.memory_space<vmem>>, vector<1x4x256xf32>
    %294 = vector.shape_cast %293 : vector<1x4x256xf32> to vector<4x256xf32>
    %295 = vector.shape_cast %292 : vector<4x256xf32> to vector<1x4x256xf32>
    tpu.vector_store %arg8[%c0_25, %c0_26, %c0_27], %295 {strides = array<i32>} : memref<1x4x256xf32, #tpu.memory_space<vmem>>, vector<1x4x256xf32>,
    return
  }
  func.func @transform_0(%arg0: i32) -> (i32, i32, i32) {
    %c0_i32 = arith.constant 0 : i32
    %c0_i32_0 = arith.constant 0 : i32
    %c0_i32_1 = arith.constant 0 : i32
    return %arg0, %c0_i32, %c0_i32_0 : i32, i32, i32
  }
  func.func @transform_1(%arg0: i32) -> (i32, i32) {
    %c0_i32 = arith.constant 0 : i32
    %c0_i32_0 = arith.constant 0 : i32
    %c0_i32_1 = arith.constant 0 : i32
    return %c0_i32, %c0_i32_0 : i32, i32
  }
  func.func @transform_2(%arg0: i32) -> (i32, i32) {
    %c0_i32 = arith.constant 0 : i32
    %c0_i32_0 = arith.constant 0 : i32
    %c0_i32_1 = arith.constant 0 : i32
    return %c0_i32, %c0_i32_0 : i32, i32
  }
  func.func @transform_3(%arg0: i32) -> (i32, i32) {
    %c0_i32 = arith.constant 0 : i32
    %c0_i32_0 = arith.constant 0 : i32
    %c0_i32_1 = arith.constant 0 : i32
    return %c0_i32, %c0_i32_0 : i32, i32
  }
  func.func @transform_4(%arg0: i32) -> (i32, i32) {
    %c0_i32 = arith.constant 0 : i32
    %c0_i32_0 = arith.constant 0 : i32
    %c0_i32_1 = arith.constant 0 : i32
    return %c0_i32, %c0_i32_0 : i32, i32
  }
  func.func @transform_5(%arg0: i32) -> (i32, i32) {
    %c0_i32 = arith.constant 0 : i32
    %c0_i32_0 = arith.constant 0 : i32
    %c0_i32_1 = arith.constant 0 : i32
    return %c0_i32, %c0_i32_0 : i32, i32
  }
  func.func @transform_6(%arg0: i32) -> (i32, i32) {
    %c0_i32 = arith.constant 0 : i32
    %c0_i32_0 = arith.constant 0 : i32
    %c0_i32_1 = arith.constant 0 : i32
    return %c0_i32, %c0_i32_0 : i32, i32
  }
  func.func @transform_7(%arg0: i32) -> (i32, i32, i32) {
    %c0_i32 = arith.constant 0 : i32
    %c0_i32_0 = arith.constant 0 : i32
    %c0_i32_1 = arith.constant 0 : i32
    return %arg0, %c0_i32, %c0_i32_0 : i32, i32, i32
  }
}

</mosaic_0001>

<bundles_post_ra>
// kernel: residule_block_forward.2
= control target key start
LH: loop header
LB: loop body
LE: loop exit
PB: predicated region body
PF: predicated region fallthrough
CT: control target
= control target key end

     0   :  { %s1214_s15 = smov 0   ;;  %s1470_s0 = inlined_call_operand.vmem [shape: f32[2,4,256], index: 0, kind: input, shape index: {}]   ;;  %s1471_s1 = inlined_call_operand.vmem [shape: f32[4,36], index: 1, kind: input, shape index: {}]   ;;  %s1472_s2 = inlined_call_operand.vmem [shape: f32[9,256], index: 2, kind: input, shape index: {}]   ;;  %s1473_s3 = inlined_call_operand.vmem [shape: f32[4,1], index: 3, kind: output, shape index: {0}]   ;;  %s1474_s4 = inlined_call_operand.vmem [shape: f32[4,1], index: 4, kind: output, shape index: {1}]  }
   0x1 LB: > { %s1033_s16 = sadd.s32 4294967295, %s1142_s15   ;;  %p1036_p0 = scmp.ge.s32.totalorder %s1142_s15, 1  ;;  %s1142_s15 = sphi %s1214_s15, %s15_s15  }
   0x2   : > { %p155_p1 = scmp.lt.s32.totalorder %s1142_s15, 3 }
   0x4   : > { %p156_p2 = pnand %p1036_p0, %p155_p1 }
   0x5   : > { %p176_p3 = scmp.lt.s32.totalorder (!%p156_p2), %s1033_s16, 1  ;;  %p1039_p4 = scmp.ne.s32.totalorder (!%p156_p2), %s1033_s16, 0 }
   0x6   : > { %159 = sbr.rel (%p156_p2) target bundleno = 447 (0x1bf), region = 32 }
   0xd   : > { %s177_s17 = scalar_select %p176_p3, %s1033_s16, 1 }
   0xe   : > { %184 = sbr.rel (%p1039_p4) target bundleno = 21 (0x15), region = 36  ;;  %vm185_vm0 = vcmask (!%p1039_p4), 3072   ;;  %v1144_v0 = vmov (!%p1039_p4), 0.0  }
   0xf   : > { %s1044_s18 = sshll.u32 %s177_s17, 3  ;;  %186 = vst.msk [vmem:[%s1473_s3] sm:$0xf] (!%p1039_p4), %vm185_vm0, %v1144_v0  ;;  %187 = vst.msk [vmem:[%s1474_s4] sm:$0xf] (!%p1039_p4), %vm185_vm0, %v1144_v0 }
  0x10   : > { %s180_s21 = scalar_lea.vmem %s1470_s0, %s1044_s18 }
  0x15 PF: > { %v1231_v1 = vld [vmem:[%s180_s21] sm:$0xff]  ;;  %v1145_v3 = vmov 0   ;;  %s1146_s28 = smov 17   ;;  %v1147_v5 = vmov 18   ;;  %v1148_v6 = vmov 9   ;;  %v1149_v7 = vmov 27  }
  0x16   : > { %v1236_v2 = vld [vmem:[%s1471_s1] sm:$0xf]  ;;  %1098 = vset.pattern.permute.xlu0 %v1145_v3  ;;  %196 = vrot.lane.b32.xlu1 %v1231_v1, %s1146_s28  ;;  %v1241_v4 = vcombine.high %v1231_v1, %v1231_v1  ;;  %v1150_v8 = vmov 1   ;;  %s1151_s29 = smov 16   ;;  %v1152_v9 = vmov 19   ;;  %v1153_v10 = vmov 10  }
  0x17   : > { %217 = vperm.xlu0 %1098, %v1236_v2   ;;  %1100 = vset.pattern.permute.xlu1 %v1147_v5  ;;  %s1154_s30 = smov 15   ;;  %v1155_v11 = vmov 11   ;;  %v1156_v12 = vmov 28   ;;  %v1157_v13 = vmov 2   ;;  %v1158_v14 = vmov 3   ;;  %s1164_s5 = smov 1  }
  0x18   : > { %v1159_v15 = vmov 20   ;;  %v1160_v16 = vmov 12   ;;  %v1161_v17 = vmov 4   ;;  %v1162_v18 = vmov 29   ;;  %s1166_s6 = smov 127   ;;  %s1168_s7 = smov 113  }
  0x19   : > { %v1163_v19 = vmov 31   ;;  %v1165_v20 = vmov 21   ;;  %v1167_v21 = vmov 23   ;;  %v1169_v22 = vmov 30   ;;  %s1184_s8 = smov 112   ;;  %s1187_s9 = smov 111  }
  0x1a   : > { %198 = vrot.lane.b32.xlu1 %v1241_v4, %s1146_s28  ;;  %v1170_v23 = vmov 15   ;;  %v1171_v24 = vmov 13   ;;  %v1172_v25 = vmov 7   ;;  %v1173_v26 = vmov 22   ;;  %v1302_v47 = vld [vmem:[%s1472_s2 + $0x8] sm:$0xff]  ;;  %v1313_v53 = vld [vmem:[%s1472_s2] sm:$0xff] }
  0x1b   : > { %1099 = vset.pattern.permute.xlu0 %v1148_v6  ;;  %v1174_v27 = vmov 16   ;;  %v1175_v28 = vmov 5   ;;  %v1176_v29 = vmov 8   ;;  %v1177_v30 = vmov 14  }
  0x1c   : > { %233 = vperm.xlu0 %1099, %v1236_v2   ;;  %v1178_v31 = vmov 17   ;;  %v1179_v32 = vmov 35   ;;  %v1180_v33 = vmov 32   ;;  %v1181_v34 = vmov 6  }
  0x1d   : > { %v1182_v35 = vmov 24   ;;  %v1183_v36 = vmov 33   ;;  %v1185_v37 = vmov 25   ;;  %v1186_v38 = vmov 34  }
  0x1e   : > { %249 = vperm.xlu1 %1100, %v1236_v2   ;;  %v1188_v40 = vmov 26   ;;  %v205_v42 = vlaneseq  ;;  %vm200_vm1 = vcmask 138240   ;;  %vm284_vm2 = vcmask 130048  }
  0x1f   : > { %vm367_vm3 = vcmask 121856   ;;  %vm450_vm4 = vcmask 7168   ;;  %vm651_vm5 = vcmask 1039360   ;;  %vm734_vm6 = vcmask 924672  }
  0x20   : > { %1101 = vset.pattern.permute.xlu0 %v1149_v7  ;;  %v1297_v45 = vshrl.u32 %v205_v42, 7  ;;  %vm817_vm7 = vcmask 916480   ;;  %vm900_vm8 = vcmask 908288   ;;  %vm980_vm9 = vcmask 1043456  }
  0x21   : > { %265 = vperm.xlu0 %1101, %v1236_v2   ;;  %vm987_vm10 = vcmask 3072  }
  0x22   : > { %1102 = vset.pattern.permute.xlu1 %v1150_v8  ;;  %v1305_v49 = vsub.s32 0, %v1297_v45  ;;  %v1318_v59 = vsub.s32 1, %v1297_v45 }
  0x23   : > { %300 = vperm.xlu1 %1102, %v1236_v2  }
  0x24   : > { %v212_v50 = vrot.slane %v1302_v47, %v1305_v49  ;;  %v208_v56 = vrot.slane %v1313_v53, %v1305_v49  ;;  %v296_v62 = vrot.slane %v1302_v47, %v1318_v59 }
  0x25   : > { %282 = vrot.lane.b32.xlu0 %v1241_v4, %s1151_s29 }
  0x26   : > { %1104 = vset.pattern.permute.xlu0 %v1152_v9 }
  0x27   : > { %280 = vrot.lane.b32.xlu1 %v1231_v1, %s1151_s29 }
  0x28   : > { %1103 = vset.pattern.permute.xlu1 %v1153_v10  ;;  %v292_v10 = vrot.slane %v1313_v53, %v1318_v59 }
  0x29   : > { %332 = vperm.xlu0 %1104, %v1236_v2  }
  0x2b   : > { %316 = vperm.xlu1 %1103, %v1236_v2  }
  0x2d   : > { %363 = vrot.lane.b32.xlu0 %v1231_v1, %s1154_s30 }
  0x2e   : > { %1107 = vset.pattern.permute.xlu0 %v1155_v11 }
  0x2f   : > { %1105 = vset.pattern.permute.xlu1 %v1156_v12 }
  0x30   : > { %348 = vperm.xlu1 %1105, %v1236_v2  }
  0x31   : > { %399 = vperm.xlu0 %1107, %v1236_v2  }
  0x34   : > { %1106 = vset.pattern.permute.xlu1 %v1157_v13  ;;  %v1335_v13 = vsub.s32 3, %v1297_v45 }
  0x35   : > { %383 = vperm.xlu1 %1106, %v1236_v2   ;;  %1110 = vset.pattern.permute.xlu0 %v1158_v14 }
  0x36   : > { %466 = vperm.xlu0 %1110, %v1236_v2  }
  0x39   : > { %365 = vrot.lane.b32.xlu1 %v1241_v4, %s1154_s30 }
  0x3a   : > { %1108 = vset.pattern.permute.xlu1 %v1159_v15  ;;  %1111 = vset.pattern.permute.xlu0 %v1160_v16 }
  0x3b   : > { %482 = vperm.xlu0 %1111, %v1236_v2  }
  0x3d   : > { %415 = vperm.xlu1 %1108, %v1236_v2  }
  0x3f   : > { %1114 = vset.pattern.permute.xlu0 %v1161_v17 }
  0x40   : > { %543 = vperm.xlu0 %1114, %v1236_v2  }
  0x41   : > { %1109 = vset.pattern.permute.xlu1 %v1162_v18 }
  0x42   : > { %431 = vperm.xlu1 %1109, %v1236_v2  }
  0x44   : > { %1117 = vset.pattern.permute.xlu0 %v1163_v19 }
  0x45   : > { %622 = vperm.xlu0 %1117, %v1236_v2  }
  0x46   : > { %446 = vrot.lane.b32.xlu1 %v1231_v1, %s1164_s5 }
  0x47   : > { %1112 = vset.pattern.permute.xlu1 %v1165_v20 }
  0x49   : > { %649 = vrot.lane.b32.xlu0 %v1241_v4, %s1166_s6 }
  0x4a   : > { %448 = vrot.lane.b32.xlu1 %v1241_v4, %s1164_s5  ;;  %1120 = vset.pattern.permute.xlu0 %v1167_v21 }
  0x4d   : > { %699 = vperm.xlu0 %1120, %v1236_v2  }
  0x4e   : > { %498 = vperm.xlu1 %1112, %v1236_v2  }
  0x51   : > { %730 = vrot.lane.b32.xlu0 %v1231_v1, %s1168_s7 }
  0x52   : > { %1113 = vset.pattern.permute.xlu1 %v1169_v22  ;;  %1123 = vset.pattern.permute.xlu0 %v1170_v23 }
  0x53   : > { %514 = vperm.xlu1 %1113, %v1236_v2  }
  0x55   : > { %766 = vperm.xlu0 %1123, %v1236_v2  }
  0x57   : > { %1115 = vset.pattern.permute.xlu1 %v1171_v24 }
  0x58   : > { %570 = vperm.xlu1 %1115, %v1236_v2  }
  0x59   : > { %1126 = vset.pattern.permute.xlu0 %v1172_v25 }
  0x5a   : > { %833 = vperm.xlu0 %1126, %v1236_v2  }
  0x5c   : > { %1116 = vset.pattern.permute.xlu1 %v1173_v26 }
  0x5d   : > { %596 = vperm.xlu1 %1116, %v1236_v2  }
  0x5e   : > { %1127 = vset.pattern.permute.xlu0 %v1174_v27 }
  0x5f   : > { %849 = vperm.xlu0 %1127, %v1236_v2  }
  0x61   : > { %1118 = vset.pattern.permute.xlu1 %v1175_v28 }
  0x62   : > { %667 = vperm.xlu1 %1118, %v1236_v2  }
  0x63   : > { %1130 = vset.pattern.permute.xlu0 %v1176_v29 }
  0x64   : > { %916 = vperm.xlu0 %1130, %v1236_v2  }
  0x66   : > { %647 = vrot.lane.b32.xlu1 %v1231_v1, %s1166_s6 }
  0x67   : > { %1119 = vset.pattern.permute.xlu1 %v1177_v30 }
  0x68   : > { %1131 = vset.pattern.permute.xlu0 %v1178_v31 }
  0x69   : > { %932 = vperm.xlu0 %1131, %v1236_v2  }
  0x6a   : > { %683 = vperm.xlu1 %1119, %v1236_v2  }
  0x6d   : > { %1134 = vset.pattern.permute.xlu0 %v1179_v32 }
  0x6e   : > { %1121 = vset.pattern.permute.xlu1 %v1180_v33 }
  0x6f   : > { %715 = vperm.xlu1 %1121, %v1236_v2  }
  0x73   : > { %1122 = vset.pattern.permute.xlu1 %v1181_v34 }
  0x74   : > { %750 = vperm.xlu1 %1122, %v1236_v2  }
  0x78   : > { %732 = vrot.lane.b32.xlu1 %v1241_v4, %s1168_s7 }
  0x79   : > { %1124 = vset.pattern.permute.xlu1 %v1182_v35 }
  0x7c   : > { %782 = vperm.xlu1 %1124, %v1236_v2  }
  0x80   : > { %1125 = vset.pattern.permute.xlu1 %v1183_v36 }
  0x81   : > { %798 = vperm.xlu1 %1125, %v1236_v2  }
  0x85   : > { %813 = vrot.lane.b32.xlu1 %v1231_v1, %s1184_s8 }
  0x86   : > { %1128 = vset.pattern.permute.xlu1 %v1185_v37 }
  0x88   : > { %v197_v39 = vpop.permute.xlu1 %196 }
  0x89   : > { %815 = vrot.lane.b32.xlu1 %v1241_v4, %s1184_s8  ;;  %v204_v58 = vsel %vm200_vm1, 0.0, %v197_v39 }
  0x8a   : > { %v213_v63 = vmul.f32 %v208_v56, %v204_v58 }
  0x8c   : > { %v199_v41 = vpop.permute.xlu1 %198  ;;  %v239_v9 = vrot.slane %v213_v63, %v1318_v59  ;;  %v223_v15 = vrot.slane %v213_v63, %v1305_v49  ;;  %v271_v30 = vrot.slane %v213_v63, %v1335_v13 }
  0x8d   : > { %865 = vperm.xlu1 %1128, %v1236_v2   ;;  %v201_v51 = vsel %vm200_vm1, %v197_v39, %v199_v41 }
  0x8e   : > { %v214_v55 = vmul.f32 %v212_v50, %v201_v51 }
  0x90   : > { %v243_v61 = vrot.slane %v214_v55, %v1318_v59  ;;  %v275_v18 = vrot.slane %v214_v55, %v1335_v13 }
  0x91   : > { %1129 = vset.pattern.permute.xlu1 %v1186_v38 }
  0x92   : > { %881 = vperm.xlu1 %1129, %v1236_v2  }
  0x96   : > { %896 = vrot.lane.b32.xlu1 %v1231_v1, %s1187_s9  ;;  %v218_v43 = vpop.permute.xlu0 %217 }
  0x97   : > { %1132 = vset.pattern.permute.xlu1 %v1188_v40  ;;  %v228_v21 = vmul.f32 %v223_v15, %v218_v43 }
  0x9a   : > { %898 = vrot.lane.b32.xlu1 %v1241_v4, %s1187_s9  ;;  %v1326_v4 = vsub.s32 2, %v1297_v45 }
  0x9b   : > { %v234_v46 = vpop.permute.xlu0 %233 }
  0x9c   : > { %v245_v3 = vmul.f32 %v243_v61, %v234_v46  ;;  %v259_v7 = vrot.slane %v214_v55, %v1326_v4  ;;  %v244_v16 = vmul.f32 %v239_v9, %v234_v46  ;;  %v255_v22 = vrot.slane %v213_v63, %v1326_v4 }
  0x9d   : > { %v250_v44 = vpop.permute.xlu1 %249  ;;  %v379_v35 = vrot.slane %v1302_v47, %v1326_v4  ;;  %v375_v56 = vrot.slane %v1313_v53, %v1326_v4 }
  0x9e   : > { %948 = vperm.xlu1 %1132, %v1236_v2   ;;  %v261_v12 = vmul.f32 %v259_v7, %v250_v44  ;;  %v246_v26 = vadd.f32 %v244_v16, %v228_v21  ;;  %v260_v27 = vmul.f32 %v255_v22, %v250_v44  ;;  %v531_v22 = vsub.s32 4, %v1297_v45 }
  0xa0   : > { %v266_v54 = vpop.permute.xlu0 %265  ;;  %v262_v36 = vadd.f32 %v260_v27, %v246_v26 }
  0xa1   : > { %v277_v25 = vmul.f32 %v275_v18, %v266_v54  ;;  %v276_v37 = vmul.f32 %v271_v30, %v266_v54 }
  0xa2   : > { %1133 = vset.pattern.permute.xlu1 %v1179_v32  ;;  %v301_v48 = vpop.permute.xlu1 %300 }
  0xa3   : > { %964 = vperm.xlu1 %1133, %v1236_v2   ;;  %v227_v2 = vrot.slane %v214_v55, %v1305_v49  ;;  %v278_v46 = vadd.f32 %v276_v37, %v262_v36  ;;  %v532_v36 = vrot.slane %v1313_v53, %v531_v22 }
  0xa4   : > { %v283_v60 = vpop.permute.xlu0 %282 }
  0xa5   : > { %v229_v6 = vmul.f32 %v227_v2, %v218_v43 }
  0xa6   : > { %v281_v52 = vpop.permute.xlu1 %280 }
  0xa7   : > { %v285_v0 = vsel %vm284_vm2, %v281_v52, %v283_v60  ;;  %v247_v11 = vadd.f32 %v245_v3, %v229_v6  ;;  %v288_v14 = vsel %vm284_vm2, 0.0, %v281_v52 }
  0xa8   : > { %v298_v8 = vmul.f32 %v296_v62, %v285_v0  ;;  %v333_v20 = vpop.permute.xlu0 %332  ;;  %v297_v23 = vmul.f32 %v292_v10, %v288_v14 }
  0xa9   : > { %v263_v24 = vadd.f32 %v261_v12, %v247_v11 }
  0xaa   : > { %v317_v57 = vpop.permute.xlu1 %316  ;;  %v310_v19 = vrot.slane %v298_v8, %v1305_v49  ;;  %v306_v31 = vrot.slane %v297_v23, %v1305_v49  ;;  %v326_v33 = vrot.slane %v298_v8, %v1318_v59  ;;  %v342_v43 = vrot.slane %v298_v8, %v1326_v4 }
  0xab   : > { %v279_v32 = vadd.f32 %v277_v25, %v263_v24  ;;  %v322_v50 = vrot.slane %v297_v23, %v1318_v59  ;;  %v358_v63 = vrot.slane %v298_v8, %v1335_v13  ;;  %v354_v15 = vrot.slane %v297_v23, %v1335_v13 }
  0xac   : > { %v312_v29 = vmul.f32 %v310_v19, %v301_v48  ;;  %v364_v34 = vpop.permute.xlu0 %363  ;;  %v311_v41 = vmul.f32 %v306_v31, %v301_v48  ;;  %v328_v42 = vmul.f32 %v326_v33, %v317_v57  ;;  %v344_v58 = vmul.f32 %v342_v43, %v333_v20 }
  0xad   : > { %v371_v54 = vsel %vm367_vm3, 0.0, %v364_v34  ;;  %v327_v61 = vmul.f32 %v322_v50, %v317_v57  ;;  %v338_v48 = vrot.slane %v297_v23, %v1326_v4  ;;  %v462_v57 = vrot.slane %v1302_v47, %v1335_v13 }
  0xae   : > { %v314_v40 = vadd.f32 %v312_v29, %v279_v32  ;;  %v313_v55 = vadd.f32 %v311_v41, %v278_v46  ;;  %v380_v3 = vmul.f32 %v375_v56, %v371_v54 }
  0xaf   : > { %v1328_v5 = vpop.permute.xlu1 %348  ;;  %v343_v9 = vmul.f32 %v338_v48, %v333_v20  ;;  %v458_v20 = vrot.slane %v1313_v53, %v1335_v13 }
  0xb0   : > { %v330_v51 = vadd.f32 %v328_v42, %v314_v40  ;;  %v329_v2 = vadd.f32 %v327_v61, %v313_v55  ;;  %v360_v6 = vmul.f32 %v358_v63, %v1328_v5  ;;  %v389_v8 = vrot.slane %v380_v3, %v1305_v49  ;;  %v400_v18 = vpop.permute.xlu0 %399 }
  0xb1   : > { %v359_v21 = vmul.f32 %v354_v15, %v1328_v5  ;;  %v405_v30 = vrot.slane %v380_v3, %v1318_v59  ;;  %v421_v5 = vrot.slane %v380_v3, %v1326_v4  ;;  %v437_v40 = vrot.slane %v380_v3, %v1335_v13 }
  0xb2   : > { %v346_v62 = vadd.f32 %v344_v58, %v330_v51  ;;  %v345_v14 = vadd.f32 %v343_v9, %v329_v2  ;;  %v536_v42 = vrot.slane %v1302_v47, %v531_v22 }
  0xb4   : > { %v1339_v17 = vpop.permute.xlu1 %383  ;;  %v362_v10 = vadd.f32 %v360_v6, %v346_v62  ;;  %v361_v29 = vadd.f32 %v359_v21, %v345_v14 }
  0xb5   : > { %v394_v23 = vmul.f32 %v389_v8, %v1339_v17  ;;  %v467_v32 = vpop.permute.xlu0 %466 }
  0xb7   : > { %v396_v37 = vadd.f32 %v394_v23, %v361_v29 }
  0xb8   : > { %v366_v28 = vpop.permute.xlu1 %365 }
  0xb9   : > { %v368_v38 = vsel %vm367_vm3, %v364_v34, %v366_v28 }
  0xba   : > { %v381_v44 = vmul.f32 %v379_v35, %v368_v38  ;;  %v410_v38 = vmul.f32 %v405_v30, %v400_v18  ;;  %v483_v55 = vpop.permute.xlu0 %482 }
  0xbc   : > { %v416_v39 = vpop.permute.xlu1 %415  ;;  %v393_v60 = vrot.slane %v381_v44, %v1305_v49  ;;  %v409_v11 = vrot.slane %v381_v44, %v1318_v59  ;;  %v425_v25 = vrot.slane %v381_v44, %v1326_v4  ;;  %v441_v43 = vrot.slane %v381_v44, %v1335_v13 }
  0xbd   : > { %v426_v46 = vmul.f32 %v421_v5, %v416_v39  ;;  %v412_v58 = vadd.f32 %v410_v38, %v396_v37  ;;  %v1395_v5 = vsub.s32 7, %v1297_v45 }
  0xbe   : > { %v395_v7 = vmul.f32 %v393_v60, %v1339_v17  ;;  %v411_v24 = vmul.f32 %v409_v11, %v400_v18  ;;  %v427_v34 = vmul.f32 %v425_v25, %v416_v39  ;;  %v539_v60 = vcombine.low %v532_v36, %v536_v42 }
  0xbf   : > { %v428_v63 = vadd.f32 %v426_v46, %v412_v58  ;;  %v544_v3 = vpop.permute.xlu0 %543 }
  0xc0   : > { %v397_v19 = vadd.f32 %v395_v7, %v362_v10  ;;  %v541_v39 = vmul.f32 %v539_v60, %v1231_v1 }
  0xc1   : > { %v432_v52 = vpop.permute.xlu1 %431 }
  0xc2   : > { %v413_v31 = vadd.f32 %v411_v24, %v397_v19  ;;  %v443_v51 = vmul.f32 %v441_v43, %v432_v52  ;;  %v442_v54 = vmul.f32 %v437_v40, %v432_v52  ;;  %v550_v8 = vrot.slane %v541_v39, %v1305_v49 }
  0xc3   : > { %v1387_v19 = vsub.s32 6, %v1297_v45 }
  0xc4   : > { %v429_v17 = vadd.f32 %v427_v34, %v413_v31  ;;  %v444_v6 = vadd.f32 %v442_v54, %v428_v63  ;;  %v623_v18 = vpop.permute.xlu0 %622  ;;  %v560_v30 = vrot.slane %v550_v8, %v1305_v49  ;;  %v576_v31 = vrot.slane %v541_v39, %v1318_v59 }
  0xc5   : > { %v447_v0 = vpop.permute.xlu1 %446 }
  0xc6   : > { %v454_v26 = vsel %vm450_vm4, 0.0, %v447_v0  ;;  %v445_v61 = vadd.f32 %v443_v51, %v429_v17  ;;  %v565_v42 = vmul.f32 %v560_v30, %v544_v3  ;;  %v586_v17 = vrot.slane %v576_v31, %v1318_v59 }
  0xc7   : > { %v463_v33 = vmul.f32 %v458_v20, %v454_v26  ;;  %v628_v51 = vrot.slane %v541_v39, %v1335_v13 }
  0xc8   : > { %v650_v37 = vpop.permute.xlu0 %649 }
  0xc9   : > { %v449_v12 = vpop.permute.xlu1 %448  ;;  %v472_v50 = vrot.slane %v463_v33, %v1305_v49  ;;  %v488_v44 = vrot.slane %v463_v33, %v1318_v59  ;;  %v504_v15 = vrot.slane %v463_v33, %v1326_v4  ;;  %v520_v20 = vrot.slane %v463_v33, %v1335_v13 }
  0xca   : > { %v451_v16 = vsel %vm450_vm4, %v447_v0, %v449_v12  ;;  %v579_v12 = vsub.s32 5, %v1297_v45  ;;  %v602_v33 = vrot.slane %v541_v39, %v1326_v4  ;;  %v632_v45 = vrot.slane %v541_v39, %v1395_v5 }
  0xcb   : > { %v464_v27 = vmul.f32 %v462_v57, %v451_v16  ;;  %v477_v0 = vmul.f32 %v472_v50, %v467_v32  ;;  %v554_v57 = vrot.slane %v541_v39, %v531_v22  ;;  %v493_v14 = vmul.f32 %v488_v44, %v483_v55 }
  0xcc   : > { %v580_v26 = vrot.slane %v541_v39, %v579_v12  ;;  %v663_v43 = vrot.slane %v1302_v47, %v579_v12 }
  0xcd   : > { %v499_v28 = vpop.permute.xlu1 %498  ;;  %v476_v35 = vrot.slane %v464_v27, %v1305_v49  ;;  %v492_v48 = vrot.slane %v464_v27, %v1318_v59  ;;  %v508_v9 = vrot.slane %v464_v27, %v1326_v4  ;;  %v479_v10 = vadd.f32 %v477_v0, %v444_v6 }
  0xce   : > { %v509_v21 = vmul.f32 %v504_v15, %v499_v28  ;;  %v524_v25 = vrot.slane %v464_v27, %v1335_v13  ;;  %v564_v22 = vrot.slane %v554_v57, %v1305_v49  ;;  %v590_v36 = vrot.slane %v580_v26, %v1318_v59 }
  0xcf   : > { %v478_v56 = vmul.f32 %v476_v35, %v467_v32  ;;  %v494_v7 = vmul.f32 %v492_v48, %v483_v55  ;;  %v510_v16 = vmul.f32 %v508_v9, %v499_v28  ;;  %v495_v1 = vadd.f32 %v493_v14, %v479_v10 }
  0xd0   : > { %v606_v28 = vrot.slane %v541_v39, %v1387_v19  ;;  %v566_v27 = vmul.f32 %v564_v22, %v544_v3  ;;  %v655_v55 = vsel %vm651_vm5, %v650_v37, 0.0  ;;  %v642_v0 = vrot.slane %v632_v45, %v1335_v13 }
  0xd1   : > { %v480_v2 = vadd.f32 %v478_v56, %v445_v61  ;;  %v511_v34 = vadd.f32 %v509_v21, %v495_v1  ;;  %v612_v56 = vrot.slane %v602_v33, %v1326_v4  ;;  %v638_v6 = vrot.slane %v628_v51, %v1335_v13 }
  0xd2   : > { %v515_v41 = vpop.permute.xlu1 %514  ;;  %v616_v46 = vrot.slane %v606_v28, %v1326_v4  ;;  %v742_v22 = vrot.slane %v1313_v53, %v1387_v19  ;;  %v746_v26 = vrot.slane %v1302_v47, %v1387_v19 }
  0xd3   : > { %v496_v52 = vadd.f32 %v494_v7, %v480_v2  ;;  %v525_v23 = vmul.f32 %v520_v20, %v515_v41  ;;  %v526_v32 = vmul.f32 %v524_v25, %v515_v41  ;;  %v659_v41 = vrot.slane %v1313_v53, %v579_v12 }
  0xd4   : > { %v665_v2 = vmul.f32 %v663_v43, %v655_v55  ;;  %v643_v14 = vmul.f32 %v638_v6, %v623_v18 }
  0xd5   : > { %v512_v24 = vadd.f32 %v510_v16, %v496_v52  ;;  %v527_v40 = vadd.f32 %v525_v23, %v511_v34  ;;  %v644_v52 = vmul.f32 %v642_v0, %v623_v18 }
  0xd6   : > { %v677_v12 = vrot.slane %v665_v2, %v1305_v49  ;;  %v693_v16 = vrot.slane %v665_v2, %v1318_v59  ;;  %v709_v30 = vrot.slane %v665_v2, %v1326_v4 }
  0xd7   : > { %v571_v62 = vpop.permute.xlu1 %570  ;;  %v528_v35 = vadd.f32 %v526_v32, %v512_v24  ;;  %v567_v61 = vadd.f32 %v565_v42, %v527_v40  ;;  %v725_v40 = vrot.slane %v665_v2, %v1335_v13 }
  0xd8   : > { %v592_v54 = vmul.f32 %v590_v36, %v571_v62  ;;  %v591_v48 = vmul.f32 %v586_v17, %v571_v62  ;;  %v700_v62 = vpop.permute.xlu0 %699 }
  0xd9   : > { %v568_v58 = vadd.f32 %v566_v27, %v528_v35 }
  0xda   : > { %v593_v9 = vadd.f32 %v591_v48, %v567_v61 }
  0xdb   : > { %v594_v7 = vadd.f32 %v592_v54, %v568_v58 }
  0xdc   : > { %v597_v11 = vpop.permute.xlu1 %596  ;;  %v731_v25 = vpop.permute.xlu0 %730 }
  0xdd   : > { %v618_v3 = vmul.f32 %v616_v46, %v597_v11  ;;  %v617_v44 = vmul.f32 %v612_v56, %v597_v11 }
  0xdf   : > { %v620_v57 = vadd.f32 %v618_v3, %v594_v7  ;;  %v619_v15 = vadd.f32 %v617_v44, %v593_v9  ;;  %v825_v44 = vrot.slane %v1313_v53, %v1395_v5 }
  0xe0   : > { %v767_v0 = vpop.permute.xlu0 %766 }
  0xe1   : > { %v668_v29 = vpop.permute.xlu1 %667  ;;  %v646_v1 = vadd.f32 %v644_v52, %v620_v57  ;;  %v645_v24 = vadd.f32 %v643_v14, %v619_v15 }
  0xe2   : > { %v679_v21 = vmul.f32 %v677_v12, %v668_v29 }
  0xe4   : > { %v681_v31 = vadd.f32 %v679_v21, %v646_v1 }
  0xe5   : > { %v648_v38 = vpop.permute.xlu1 %647 }
  0xe6   : > { %v652_v50 = vsel %vm651_vm5, %v648_v38, %v650_v37  ;;  %v711_v38 = vmul.f32 %v709_v30, %v700_v62 }
  0xe7   : > { %v664_v63 = vmul.f32 %v659_v41, %v652_v50 }
  0xe9   : > { %v684_v60 = vpop.permute.xlu1 %683  ;;  %v673_v39 = vrot.slane %v664_v63, %v1305_v49  ;;  %v689_v11 = vrot.slane %v664_v63, %v1318_v59  ;;  %v721_v46 = vrot.slane %v664_v63, %v1335_v13 }
  0xea   : > { %v695_v23 = vmul.f32 %v693_v16, %v684_v60 }
  0xeb   : > { %v678_v8 = vmul.f32 %v673_v39, %v668_v29  ;;  %v694_v28 = vmul.f32 %v689_v11, %v684_v60  ;;  %v705_v29 = vrot.slane %v664_v63, %v1326_v4  ;;  %v829_v63 = vrot.slane %v1302_v47, %v1395_v5  ;;  %v834_v47 = vpop.permute.xlu0 %833 }
  0xec   : > { %v697_v37 = vadd.f32 %v695_v23, %v681_v31 }
  0xed   : > { %v680_v18 = vadd.f32 %v678_v8, %v645_v24  ;;  %v710_v19 = vmul.f32 %v705_v29, %v700_v62 }
  0xee   : > { %v716_v10 = vpop.permute.xlu1 %715  ;;  %v713_v43 = vadd.f32 %v711_v38, %v697_v37 }
  0xef   : > { %v696_v36 = vadd.f32 %v694_v28, %v680_v18  ;;  %v727_v50 = vmul.f32 %v725_v40, %v716_v10  ;;  %v726_v51 = vmul.f32 %v721_v46, %v716_v10  ;;  %v850_v29 = vpop.permute.xlu0 %849 }
  0xf1   : > { %v712_v45 = vadd.f32 %v710_v19, %v696_v36  ;;  %v729_v60 = vadd.f32 %v727_v50, %v713_v43  ;;  %v1041_v43 = vld [vmem:[%s1472_s2 + $0x18] ss:$0 sm:$0xff] }
  0xf3   : > { %v751_v20 = vpop.permute.xlu1 %750  ;;  %v728_v54 = vadd.f32 %v726_v51, %v712_v45  ;;  %v1040_v45 = vld [vmem:[%s1472_s2 + $0x10] ss:$0 sm:$0xff]  ;;  %v917_v46 = vpop.permute.xlu0 %916 }
  0xf7   : > { %v733_v32 = vpop.permute.xlu1 %732 }
  0xf8   : > { %v735_v34 = vsel %vm734_vm6, %v731_v25, %v733_v32  ;;  %v738_v33 = vsel %vm734_vm6, %v733_v32, 0.0 }
  0xf9   : > { %v747_v35 = vmul.f32 %v742_v22, %v735_v34  ;;  %v748_v27 = vmul.f32 %v746_v26, %v738_v33 }
  0xfb   : > { %v783_v42 = vpop.permute.xlu1 %782  ;;  %v756_v17 = vrot.slane %v747_v35, %v1305_v49  ;;  %v760_v41 = vrot.slane %v748_v27, %v1305_v49  ;;  %v772_v61 = vrot.slane %v747_v35, %v1318_v59  ;;  %v776_v48 = vrot.slane %v748_v27, %v1318_v59 }
  0xfc   : > { %v788_v7 = vrot.slane %v747_v35, %v1326_v4  ;;  %v792_v9 = vrot.slane %v748_v27, %v1326_v4  ;;  %v804_v53 = vrot.slane %v747_v35, %v1335_v13  ;;  %v808_v21 = vrot.slane %v748_v27, %v1335_v13 }
  0xfd   : > { %v761_v55 = vmul.f32 %v756_v17, %v751_v20  ;;  %v762_v56 = vmul.f32 %v760_v41, %v751_v20  ;;  %v777_v39 = vmul.f32 %v772_v61, %v767_v0  ;;  %v778_v10 = vmul.f32 %v776_v48, %v767_v0 }
  0xfe   : > { %v793_v62 = vmul.f32 %v788_v7, %v783_v42  ;;  %v794_v8 = vmul.f32 %v792_v9, %v783_v42 }
  0xff   : > { %v763_v2 = vadd.f32 %v761_v55, %v728_v54  ;;  %v764_v3 = vadd.f32 %v762_v56, %v729_v60 }
 0x100   : > { %v799_v58 = vpop.permute.xlu1 %798 }
 0x101   : > { %v779_v52 = vadd.f32 %v777_v39, %v763_v2  ;;  %v780_v57 = vadd.f32 %v778_v10, %v764_v3  ;;  %v809_v22 = vmul.f32 %v804_v53, %v799_v58  ;;  %v810_v26 = vmul.f32 %v808_v21, %v799_v58  ;;  %v933_v10 = vpop.permute.xlu0 %932 }
 0x103   : > { %v795_v5 = vadd.f32 %v793_v62, %v779_v52  ;;  %v796_v20 = vadd.f32 %v794_v8, %v780_v57 }
 0x104   : > { %v814_v6 = vpop.permute.xlu1 %813 }
 0x105   : > { %v811_v30 = vadd.f32 %v809_v22, %v795_v5  ;;  %v812_v31 = vadd.f32 %v810_v26, %v796_v20 }
 0x108   : > { %v816_v12 = vpop.permute.xlu1 %815 }
 0x109   : > { %v818_v14 = vsel %vm817_vm7, %v814_v6, %v816_v12  ;;  %v821_v15 = vsel %vm817_vm7, %v816_v12, 0.0 }
 0x10a   : > { %v830_v16 = vmul.f32 %v825_v44, %v818_v14  ;;  %v831_v1 = vmul.f32 %v829_v63, %v821_v15 }
 0x10c   : > { %v839_v24 = vrot.slane %v830_v16, %v1305_v49  ;;  %v843_v11 = vrot.slane %v831_v1, %v1305_v49  ;;  %v866_v25 = vpop.permute.xlu1 %865  ;;  %v855_v32 = vrot.slane %v830_v16, %v1318_v59  ;;  %v859_v28 = vrot.slane %v831_v1, %v1318_v59 }
 0x10d   : > { %v871_v27 = vrot.slane %v830_v16, %v1326_v4  ;;  %v875_v36 = vrot.slane %v831_v1, %v1326_v4  ;;  %v887_v50 = vrot.slane %v830_v16, %v1335_v13  ;;  %v891_v51 = vrot.slane %v831_v1, %v1335_v13 }
 0x10e   : > { %v844_v18 = vmul.f32 %v839_v24, %v834_v47  ;;  %v845_v23 = vmul.f32 %v843_v11, %v834_v47  ;;  %v860_v37 = vmul.f32 %v855_v32, %v850_v29  ;;  %v861_v38 = vmul.f32 %v859_v28, %v850_v29  ;;  %v979_v29 = vld [vmem:[%s1473_s3] sm:$0xf] }
 0x10f   : > { %v876_v17 = vmul.f32 %v871_v27, %v866_v25  ;;  %v877_v41 = vmul.f32 %v875_v36, %v866_v25 }
 0x110   : > { %v846_v33 = vadd.f32 %v844_v18, %v811_v30  ;;  %v847_v35 = vadd.f32 %v845_v23, %v812_v31 }
 0x111   : > { %v882_v34 = vpop.permute.xlu1 %881 }
 0x112   : > { %v862_v42 = vadd.f32 %v860_v37, %v846_v33  ;;  %v863_v19 = vadd.f32 %v861_v38, %v847_v35  ;;  %v892_v0 = vmul.f32 %v887_v50, %v882_v34  ;;  %v893_v2 = vmul.f32 %v891_v51, %v882_v34  ;;  %v989_v33 = vld [vmem:[%s1474_s4] sm:$0xf] }
 0x114   : > { %v878_v56 = vadd.f32 %v876_v17, %v862_v42  ;;  %v879_v58 = vadd.f32 %v877_v41, %v863_v19 }
 0x115   : > { %v897_v40 = vpop.permute.xlu1 %896 }
 0x116   : > { %v894_v9 = vadd.f32 %v892_v0, %v878_v56  ;;  %v895_v39 = vadd.f32 %v893_v2, %v879_v58 }
 0x119   : > { %v899_v55 = vpop.permute.xlu1 %898 }
 0x11a   : > { %v901_v54 = vsel %vm900_vm8, %v897_v40, %v899_v55  ;;  %v904_v60 = vsel %vm900_vm8, %v899_v55, 0.0 }
 0x11b   : > { %v913_v61 = vmul.f32 %v1040_v45, %v901_v54  ;;  %v914_v48 = vmul.f32 %v1041_v43, %v904_v60 }
 0x11d   : > { %v922_v3 = vrot.slane %v913_v61, %v1305_v49  ;;  %v926_v6 = vrot.slane %v914_v48, %v1305_v49  ;;  %v938_v44 = vrot.slane %v913_v61, %v1318_v59  ;;  %v942_v63 = vrot.slane %v914_v48, %v1318_v59  ;;  %v949_v7 = vpop.permute.xlu1 %948 }
 0x11e   : > { %v954_v12 = vrot.slane %v913_v61, %v1326_v4  ;;  %v958_v14 = vrot.slane %v914_v48, %v1326_v4  ;;  %v970_v49 = vrot.slane %v913_v61, %v1335_v13  ;;  %v974_v1 = vrot.slane %v914_v48, %v1335_v13 }
 0x11f   : > { %v927_v52 = vmul.f32 %v922_v3, %v917_v46  ;;  %v928_v57 = vmul.f32 %v926_v6, %v917_v46  ;;  %v943_v8 = vmul.f32 %v938_v44, %v933_v10  ;;  %v944_v16 = vmul.f32 %v942_v63, %v933_v10 }
 0x120   : > { %v959_v47 = vmul.f32 %v954_v12, %v949_v7  ;;  %v960_v5 = vmul.f32 %v958_v14, %v949_v7 }
 0x121   : > { %v929_v15 = vadd.f32 %v927_v52, %v894_v9  ;;  %v930_v62 = vadd.f32 %v928_v57, %v895_v39 }
 0x122   : > { %v965_v53 = vpop.permute.xlu1 %964 }
 0x123   : > { %v945_v59 = vadd.f32 %v943_v8, %v929_v15  ;;  %v946_v21 = vadd.f32 %v944_v16, %v930_v62  ;;  %v975_v11 = vmul.f32 %v970_v49, %v965_v53  ;;  %v976_v25 = vmul.f32 %v974_v1, %v965_v53 }
 0x125   : > { %v961_v20 = vadd.f32 %v959_v47, %v945_v59  ;;  %v962_v24 = vadd.f32 %v960_v5, %v946_v21 }
 0x127   : > { %v977_v22 = vadd.f32 %v975_v11, %v961_v20  ;;  %v978_v4 = vadd.f32 %v976_v25, %v962_v24 }
 0x129   : > { %v981_v26 = vsel %vm980_vm9, %v977_v22, 0.0  ;;  %v982_v18 = vsel %vm980_vm9, %v978_v4, 0.0  ;;  %v990_v23 = vmul.f32 %v977_v22, %v977_v22  ;;  %v991_v30 = vmul.f32 %v978_v4, %v978_v4 }
 0x12a   : > { %v983_v31 = vadd.f32 %v982_v18, %v981_v26 }
 0x12b   : > { %v992_v32 = vsel %vm980_vm9, %v990_v23, 0.0  ;;  %v993_v28 = vsel %vm980_vm9, %v991_v30, 0.0 }
 0x12c   : > { %984 = vadd.xlane.f32.xlu0 %v983_v31  ;;  %v994_v13 = vadd.f32 %v993_v28, %v992_v32 }
 0x12e   : > { %995 = vadd.xlane.f32.xlu1 %v994_v13 }
 0x1b9   : > { %v985_v34 = vpop.xlane.xlu0 %984 }
 0x1ba   : > { %v986_v35 = vadd.f32 %v985_v34, %v979_v29 }
 0x1bb   : > { %v996_v27 = vpop.xlane.xlu1 %995 }
 0x1bc   : > { %988 = vst.msk [vmem:[%s1473_s3] sm:$0xf] %vm987_vm10, %v986_v35  ;;  %v997_v36 = vadd.f32 %v996_v27, %v989_v33 }
 0x1be   : > { %998 = vst.msk [vmem:[%s1474_s4] sm:$0xf] %vm987_vm10, %v997_v36 }
 0x1bf PF: > { %s15_s15 = sadd.s32 1, %s1142_s15  }
 0x1c0   : > { %p12_p5 = scmp.ge.s32.totalorder %s15_s15, 4  }
 0x1c2   :  { %14 = sbr.rel (!%p12_p5) target bundleno = 1 (0x1), region = 70 }

// kernel: residule_block_forward.3
= control target key start
LH: loop header
LB: loop body
LE: loop exit
PB: predicated region body
PF: predicated region fallthrough
CT: control target
= control target key end

     0   :  { %s1360_s24 = smov 0   ;;  %s1648_s0 = inlined_call_operand.vmem [shape: f32[2,4,256], index: 0, kind: input, shape index: {}]   ;;  %s1649_s1 = inlined_call_operand.vmem [shape: f32[4,36], index: 1, kind: input, shape index: {}]   ;;  %s1650_s2 = inlined_call_operand.vmem [shape: f32[9,256], index: 2, kind: input, shape index: {}]   ;;  %s1651_s3 = inlined_call_operand.vmem [shape: f32[4,1], index: 3, kind: input, shape index: {}]   ;;  %s1652_s4 = inlined_call_operand.vmem [shape: f32[4,1], index: 4, kind: input, shape index: {}]   ;;  %s1653_s5 = inlined_call_operand.vmem [shape: f32[4,1], index: 5, kind: input, shape index: {}]   ;;  %s1654_s6 = inlined_call_operand.vmem [shape: f32[4,1], index: 6, kind: input, shape index: {}]   ;;  %s1655_s7 = inlined_call_operand.vmem [shape: f32[2,4,256], index: 7, kind: output, shape index: {}]  }
   0x1 LB: > { %s1160_s25 = sadd.s32 4294967295, %s1274_s24   ;;  %p1164_p0 = scmp.ge.s32.totalorder %s1274_s24, 1  ;;  %s1274_s24 = sphi %s1360_s24, %s17_s24  }
   0x2   : > { %p237_p1 = scmp.lt.s32.totalorder %s1274_s24, 3 }
   0x4   : > { %p238_p2 = pnand %p1164_p0, %p237_p1 }
   0x5   : > { %v1371_v0 = vld [vmem:[%s1649_s1] sm:$0xf] (!%p238_p2)  ;;  %p269_p3 = scmp.lt.s32.totalorder (!%p238_p2), %s1160_s25, 1  ;;  %v1276_v1 = vmov (!%p238_p2), 0   ;;  %v1277_v2 = vmov (!%p238_p2), 18   ;;  %v1278_v3 = vmov (!%p238_p2), 9   ;;  %v296_v51 = vlaneseq (!%p238_p2) }
   0x6   : > { %241 = sbr.rel (%p238_p2) target bundleno = 292 (0x124), region = 48  ;;  %1227 = vset.pattern.permute.xlu1 (!%p238_p2), %v1276_v1  ;;  %1229 = vset.pattern.permute.xlu0 (!%p238_p2), %v1277_v2  ;;  %s1279_s9 = smov (!%p238_p2), 17   ;;  %v1280_v6 = vmov (!%p238_p2), 27   ;;  %v1282_v7 = vmov (!%p238_p2), 1   ;;  %v1283_v8 = vmov (!%p238_p2), 10   ;;  %v1284_v9 = vmov (!%p238_p2), 19  }
   0x7   : > { %308 = vperm.xlu1 (!%p238_p2), %1227, %v1371_v0   ;;  %s1281_s10 = smov (!%p238_p2), 16   ;;  %s1285_s11 = smov (!%p238_p2), 15   ;;  %v1286_v10 = vmov (!%p238_p2), 2   ;;  %v1287_v11 = vmov (!%p238_p2), 28   ;;  %v1288_v12 = vmov (!%p238_p2), 11   ;;  %v1289_v13 = vmov (!%p238_p2), 29  }
   0x8   : > { %s1290_s12 = smov (!%p238_p2), 1   ;;  %v1291_v14 = vmov (!%p238_p2), 21   ;;  %v1292_v15 = vmov (!%p238_p2), 20   ;;  %v1293_v16 = vmov (!%p238_p2), 3   ;;  %v1294_v17 = vmov (!%p238_p2), 13   ;;  %s1306_s17 = smov (!%p238_p2), 127  }
   0x9   : > { %v1295_v18 = vmov (!%p238_p2), 5   ;;  %v1296_v19 = vmov (!%p238_p2), 12   ;;  %v1297_v20 = vmov (!%p238_p2), 14   ;;  %v1298_v21 = vmov (!%p238_p2), 30   ;;  %v1070_v22 = vld [vmem:[%s1651_s3] sm:$0xf] (!%p238_p2) }
   0xa   : > { %v1299_v23 = vmov (!%p238_p2), 6   ;;  %v1418_v24 = vmul.f32 (!%p238_p2), 0.001953125, %v1070_v22  ;;  %v1072_v25 = vld [vmem:[%s1652_s4] sm:$0xf] (!%p238_p2)  ;;  %v1300_v26 = vmov (!%p238_p2), 4   ;;  %v1301_v29 = vmov (!%p238_p2), 15  }
   0xb   : > { %1228 = vset.pattern.permute.xlu1 (!%p238_p2), %v1278_v3  ;;  %v1073_v27 = vmul.f32 (!%p238_p2), 0.001953125, %v1072_v25  ;;  %v1302_v30 = vmov (!%p238_p2), 22   ;;  %v1303_v32 = vmov (!%p238_p2), 7   ;;  %v1304_v33 = vmov (!%p238_p2), 31   ;;  %v1078_v40 = vld [vmem:[%s1653_s5] sm:$0xf] (!%p238_p2) }
   0xc   : > { %324 = vperm.xlu1 (!%p238_p2), %1228, %v1371_v0   ;;  %v1074_v28 = vmul.f32 (!%p238_p2), %v1418_v24, %v1418_v24  ;;  %v1305_v35 = vmov (!%p238_p2), 16   ;;  %v1307_v36 = vmov (!%p238_p2), 23   ;;  %v1308_v37 = vmov (!%p238_p2), 8   ;;  %s1311_s20 = smov (!%p238_p2), 113   ;;  %s1314_s21 = smov (!%p238_p2), 112   ;;  %v1471_v62 = vld [vmem:[%s1650_s2 + $0x8] sm:$0xff] (!%p238_p2) }
   0xd   : > { %s1657_s25 = smov (!%p269_p3, %s1160_s25), 1  ;;  %v1309_v38 = vmov 17   ;;  %v1310_v41 = vmov 32   ;;  %v1312_v43 = vmov 24   ;;  %v1313_v44 = vmov 33   ;;  %s1317_s22 = smov 111  }
   0xe   : > { %s1173_s28 = sshll.u32 %s1657_s25, 3  ;;  %v1075_v31 = vsub.f32 %v1073_v27, %v1074_v28  ;;  %v1315_v45 = vmov 25   ;;  %v1316_v46 = vmov 34   ;;  %v1318_v48 = vmov 26   ;;  %v1080_v54 = vld [vmem:[%s1654_s6] sm:$0xf] }
   0xf   : > { %s273_s8 = scalar_lea.vmem %s1648_s0, %s1173_s28  ;;  %v1319_v56 = vmov 35   ;;  %v1461_v57 = vshrl.u32 %v296_v51, 7  ;;  %vm291_vm0 = vcmask 138240   ;;  %vm375_vm1 = vcmask 130048   ;;  %s278_s15 = scalar_lea.vmem %s1655_s7, %s1173_s28 }
  0x10   : > { %v1383_v4 = vld [vmem:[%s273_s8] sm:$0xff]  ;;  %1230 = vset.pattern.permute.xlu1 %v1280_v6  ;;  %v1076_v34 = vadd.f32 1e-05, %v1075_v31  ;;  %vm458_vm2 = vcmask 121856   ;;  %vm541_vm3 = vcmask 7168   ;;  %vm742_vm4 = vcmask 1039360  }
  0x11   : > { %287 = vrot.lane.b32.xlu0 %v1383_v4, %s1279_s9  ;;  %v1389_v5 = vcombine.high %v1383_v4, %v1383_v4  ;;  %356 = vperm.xlu1 %1230, %v1371_v0   ;;  %v1465_v61 = vsub.s32 0, %v1461_v57  ;;  %v1499_v22 = vsub.s32 3, %v1461_v57  ;;  %vm825_vm5 = vcmask 924672  }
  0x12   : > { %1266 = vrsqrt.f32 %v1076_v34  ;;  %vm908_vm6 = vcmask 916480   ;;  %vm991_vm7 = vcmask 908288  }
  0x13   : > { %v303_v2 = vrot.slane %v1471_v62, %v1465_v61 }
  0x15   : > { %289 = vrot.lane.b32.xlu0 %v1389_v5, %s1279_s9  ;;  %371 = vrot.lane.b32.xlu1 %v1383_v4, %s1281_s10 }
  0x16   : > { %1231 = vset.pattern.permute.xlu1 %v1282_v7 }
  0x19   : > { %340 = vperm.xlu0 %1229, %v1371_v0   ;;  %391 = vperm.xlu1 %1231, %v1371_v0  }
  0x1c   : > { %v1267_v39 = vpop.eup %1266 }
  0x1d   : > { %373 = vrot.lane.b32.xlu0 %v1389_v5, %s1281_s10  ;;  %1233 = vset.pattern.permute.xlu1 %v1284_v9  ;;  %v1079_v42 = vmul.f32 %v1267_v39, %v1078_v40 }
  0x1e   : > { %1232 = vset.pattern.permute.xlu0 %v1283_v8  ;;  %423 = vperm.xlu1 %1233, %v1371_v0  }
  0x1f   : > { %v1081_v53 = vmul.f32 %v1079_v42, %v1418_v24 }
  0x21   : > { %407 = vperm.xlu0 %1232, %v1371_v0   ;;  %v1082_v58 = vsub.f32 %v1080_v54, %v1081_v53 }
  0x22   : > { %1234 = vset.pattern.permute.xlu1 %v1287_v11 }
  0x23   : > { %439 = vperm.xlu1 %1234, %v1371_v0  }
  0x25   : > { %454 = vrot.lane.b32.xlu0 %v1383_v4, %s1285_s11 }
  0x26   : > { %1235 = vset.pattern.permute.xlu0 %v1286_v10  ;;  %v1488_v10 = vsub.s32 2, %v1461_v57 }
  0x27   : > { %456 = vrot.lane.b32.xlu1 %v1389_v5, %s1285_s11 }
  0x28   : > { %1236 = vset.pattern.permute.xlu1 %v1288_v12 }
  0x29   : > { %474 = vperm.xlu0 %1235, %v1371_v0  }
  0x2b   : > { %490 = vperm.xlu1 %1236, %v1371_v0  }
  0x2d   : > { %1238 = vset.pattern.permute.xlu0 %v1289_v13 }
  0x2e   : > { %522 = vperm.xlu0 %1238, %v1371_v0  }
  0x2f   : > { %1237 = vset.pattern.permute.xlu1 %v1292_v15 }
  0x30   : > { %506 = vperm.xlu1 %1237, %v1371_v0  }
  0x32   : > { %539 = vrot.lane.b32.xlu0 %v1389_v5, %s1290_s12 }
  0x33   : > { %1241 = vset.pattern.permute.xlu0 %v1291_v14 }
  0x34   : > { %537 = vrot.lane.b32.xlu1 %v1383_v4, %s1290_s12 }
  0x35   : > { %1239 = vset.pattern.permute.xlu1 %v1293_v16 }
  0x36   : > { %589 = vperm.xlu0 %1241, %v1371_v0  }
  0x38   : > { %557 = vperm.xlu1 %1239, %v1371_v0  }
  0x3a   : > { %1244 = vset.pattern.permute.xlu0 %v1294_v17 }
  0x3b   : > { %661 = vperm.xlu0 %1244, %v1371_v0  }
  0x3c   : > { %1240 = vset.pattern.permute.xlu1 %v1296_v19 }
  0x3d   : > { %573 = vperm.xlu1 %1240, %v1371_v0  }
  0x3f   : > { %1247 = vset.pattern.permute.xlu0 %v1295_v18 }
  0x40   : > { %758 = vperm.xlu0 %1247, %v1371_v0  }
  0x41   : > { %1242 = vset.pattern.permute.xlu1 %v1298_v21 }
  0x42   : > { %605 = vperm.xlu1 %1242, %v1371_v0  }
  0x44   : > { %1248 = vset.pattern.permute.xlu0 %v1297_v20 }
  0x45   : > { %774 = vperm.xlu0 %1248, %v1371_v0  }
  0x46   : > { %1243 = vset.pattern.permute.xlu1 %v1300_v26 }
  0x47   : > { %634 = vperm.xlu1 %1243, %v1371_v0  }
  0x49   : > { %1251 = vset.pattern.permute.xlu0 %v1299_v23 }
  0x4a   : > { %841 = vperm.xlu0 %1251, %v1371_v0  }
  0x4b   : > { %1245 = vset.pattern.permute.xlu1 %v1302_v30 }
  0x4c   : > { %687 = vperm.xlu1 %1245, %v1371_v0  }
  0x4e   : > { %1252 = vset.pattern.permute.xlu0 %v1301_v29 }
  0x4f   : > { %857 = vperm.xlu0 %1252, %v1371_v0  }
  0x50   : > { %1246 = vset.pattern.permute.xlu1 %v1304_v33 }
  0x51   : > { %713 = vperm.xlu1 %1246, %v1371_v0  }
  0x53   : > { %1255 = vset.pattern.permute.xlu0 %v1303_v32 }
  0x54   : > { %924 = vperm.xlu0 %1255, %v1371_v0  }
  0x55   : > { %738 = vrot.lane.b32.xlu1 %v1383_v4, %s1306_s17 }
  0x56   : > { %1249 = vset.pattern.permute.xlu1 %v1307_v36 }
  0x58   : > { %1256 = vset.pattern.permute.xlu0 %v1305_v35 }
  0x59   : > { %940 = vperm.xlu0 %1256, %v1371_v0   ;;  %740 = vrot.lane.b32.xlu1 %v1389_v5, %s1306_s17 }
  0x5d   : > { %1259 = vset.pattern.permute.xlu0 %v1308_v37  ;;  %790 = vperm.xlu1 %1249, %v1371_v0  }
  0x5e   : > { %1007 = vperm.xlu0 %1259, %v1371_v0  }
  0x61   : > { %1250 = vset.pattern.permute.xlu1 %v1310_v41 }
  0x62   : > { %1260 = vset.pattern.permute.xlu0 %v1309_v38  ;;  %806 = vperm.xlu1 %1250, %v1371_v0  }
  0x63   : > { %1023 = vperm.xlu0 %1260, %v1371_v0  }
  0x66   : > { %821 = vrot.lane.b32.xlu1 %v1383_v4, %s1311_s20 }
  0x67   : > { %1263 = vset.pattern.permute.xlu0 %v1276_v1  ;;  %1253 = vset.pattern.permute.xlu1 %v1312_v43 }
  0x68   : > { %1085 = vperm.xlu0 %1263, %v1079_v42  }
  0x6a   : > { %823 = vrot.lane.b32.xlu1 %v1389_v5, %s1311_s20 }
  0x6e   : > { %873 = vperm.xlu1 %1253, %v1371_v0  }
  0x72   : > { %1254 = vset.pattern.permute.xlu1 %v1313_v44 }
  0x73   : > { %889 = vperm.xlu1 %1254, %v1371_v0  }
  0x77   : > { %904 = vrot.lane.b32.xlu1 %v1383_v4, %s1314_s21 }
  0x78   : > { %1257 = vset.pattern.permute.xlu1 %v1315_v45 }
  0x7b   : > { %906 = vrot.lane.b32.xlu1 %v1389_v5, %s1314_s21 }
  0x7f   : > { %956 = vperm.xlu1 %1257, %v1371_v0  }
  0x83   : > { %1258 = vset.pattern.permute.xlu1 %v1316_v46  ;;  %v288_v52 = vpop.permute.xlu0 %287 }
  0x84   : > { %972 = vperm.xlu1 %1258, %v1371_v0   ;;  %v295_v8 = vsel %vm291_vm0, 0.0, %v288_v52 }
  0x86   : > { %v1450_v47 = vpop.permute.xlu1 %308 }
  0x87   : > { %v290_v59 = vpop.permute.xlu0 %289 }
  0x88   : > { %987 = vrot.lane.b32.xlu1 %v1383_v4, %s1317_s22  ;;  %v292_v6 = vsel %vm291_vm0, %v288_v52, %v290_v59 }
  0x89   : > { %1261 = vset.pattern.permute.xlu1 %v1318_v48  ;;  %v305_v9 = vmul.f32 %v303_v2, %v292_v6 }
  0x8b   : > { %v325_v49 = vpop.permute.xlu1 %324  ;;  %v318_v17 = vrot.slane %v305_v9, %v1465_v61  ;;  %v350_v18 = vrot.slane %v305_v9, %v1488_v10  ;;  %v366_v34 = vrot.slane %v305_v9, %v1499_v22 }
  0x8c   : > { %989 = vrot.lane.b32.xlu1 %v1389_v5, %s1317_s22 }
  0x8d   : > { %v320_v28 = vmul.f32 %v318_v17, %v1450_v47 }
  0x90   : > { %v1454_v50 = vpop.permute.xlu1 %356  ;;  %1039 = vperm.xlu1 %1261, %v1371_v0  }
  0x91   : > { %v368_v42 = vmul.f32 %v366_v34, %v1454_v50  ;;  %v622_v34 = vsub.s32 4, %v1461_v57 }
  0x94   : > { %v372_v55 = vpop.permute.xlu1 %371  ;;  %1262 = vset.pattern.permute.xlu1 %v1319_v56 }
  0x95   : > { %1055 = vperm.xlu1 %1262, %v1371_v0   ;;  %v1476_v0 = vld [vmem:[%s1650_s2] sm:$0xff]  ;;  %v379_v27 = vsel %vm375_vm1, 0.0, %v372_v55 }
  0x96   : > { %v299_v7 = vrot.slane %v1476_v0, %v1465_v61  ;;  %v466_v59 = vrot.slane %v1476_v0, %v1488_v10 }
  0x98   : > { %v392_v60 = vpop.permute.xlu1 %391  ;;  %v341_v63 = vpop.permute.xlu0 %340  ;;  %v304_v15 = vmul.f32 %v299_v7, %v295_v8 }
  0x99   : > { %1264 = vset.pattern.permute.xlu1 %v1276_v1  ;;  %v1483_v1 = vsub.s32 1, %v1461_v57  ;;  %v352_v29 = vmul.f32 %v350_v18, %v341_v63 }
  0x9a   : > { %1092 = vperm.xlu1 %1264, %v1082_v58   ;;  %v314_v25 = vrot.slane %v304_v15, %v1465_v61  ;;  %v346_v26 = vrot.slane %v304_v15, %v1488_v10  ;;  %v362_v41 = vrot.slane %v304_v15, %v1499_v22 }
  0x9b   : > { %v334_v13 = vrot.slane %v305_v9, %v1483_v1  ;;  %v387_v14 = vrot.slane %v1471_v62, %v1483_v1  ;;  %v330_v19 = vrot.slane %v304_v15, %v1483_v1  ;;  %v383_v23 = vrot.slane %v1476_v0, %v1483_v1 }
  0x9c   : > { %v374_v11 = vpop.permute.xlu0 %373  ;;  %v319_v37 = vmul.f32 %v314_v25, %v1450_v47  ;;  %v351_v38 = vmul.f32 %v346_v26, %v341_v63  ;;  %v470_v47 = vrot.slane %v1471_v62, %v1488_v10  ;;  %v367_v52 = vmul.f32 %v362_v41, %v1454_v50 }
  0x9d   : > { %v1480_v3 = vpop.permute.xlu1 %423  ;;  %v376_v16 = vsel %vm375_vm1, %v372_v55, %v374_v11  ;;  %v336_v21 = vmul.f32 %v334_v13, %v325_v49  ;;  %v335_v31 = vmul.f32 %v330_v19, %v325_v49  ;;  %v388_v35 = vmul.f32 %v383_v23, %v379_v27 }
  0x9e   : > { %v389_v24 = vmul.f32 %v387_v14, %v376_v16 }
  0x9f   : > { %v338_v33 = vadd.f32 %v336_v21, %v320_v28  ;;  %v337_v40 = vadd.f32 %v335_v31, %v319_v37  ;;  %v397_v43 = vrot.slane %v388_v35, %v1465_v61  ;;  %v413_v63 = vrot.slane %v388_v35, %v1483_v1 }
  0xa0   : > { %v408_v30 = vpop.permute.xlu0 %407  ;;  %v401_v36 = vrot.slane %v389_v24, %v1465_v61  ;;  %v417_v51 = vrot.slane %v389_v24, %v1483_v1  ;;  %v433_v6 = vrot.slane %v389_v24, %v1488_v10  ;;  %v449_v17 = vrot.slane %v389_v24, %v1499_v22 }
  0xa1   : > { %v354_v39 = vadd.f32 %v352_v29, %v338_v33  ;;  %v353_v48 = vadd.f32 %v351_v38, %v337_v40  ;;  %v402_v54 = vmul.f32 %v397_v43, %v392_v60  ;;  %v418_v13 = vmul.f32 %v413_v63, %v408_v30 }
  0xa2   : > { %v1490_v12 = vpop.permute.xlu1 %439  ;;  %v403_v44 = vmul.f32 %v401_v36, %v392_v60  ;;  %v419_v2 = vmul.f32 %v417_v51, %v408_v30  ;;  %v429_v60 = vrot.slane %v388_v35, %v1488_v10  ;;  %v435_v15 = vmul.f32 %v433_v6, %v1480_v3 }
  0xa3   : > { %v370_v49 = vadd.f32 %v368_v42, %v354_v39  ;;  %v369_v58 = vadd.f32 %v367_v52, %v353_v48  ;;  %v451_v26 = vmul.f32 %v449_v17, %v1490_v12  ;;  %v549_v24 = vrot.slane %v1476_v0, %v1499_v22 }
  0xa4   : > { %v455_v45 = vpop.permute.xlu0 %454  ;;  %v434_v23 = vmul.f32 %v429_v60, %v1480_v3  ;;  %v553_v33 = vrot.slane %v1471_v62, %v1499_v22  ;;  %v627_v48 = vrot.slane %v1471_v62, %v622_v34 }
  0xa5   : > { %v405_v55 = vadd.f32 %v403_v44, %v370_v49  ;;  %v462_v9 = vsel %vm458_vm2, 0.0, %v455_v45  ;;  %v404_v11 = vadd.f32 %v402_v54, %v369_v58 }
  0xa6   : > { %v457_v20 = vpop.permute.xlu1 %456  ;;  %v471_v16 = vmul.f32 %v466_v59, %v462_v9 }
  0xa7   : > { %v459_v53 = vsel %vm458_vm2, %v455_v45, %v457_v20  ;;  %v421_v14 = vadd.f32 %v419_v2, %v405_v55  ;;  %v445_v20 = vrot.slane %v388_v35, %v1499_v22  ;;  %v420_v21 = vadd.f32 %v418_v13, %v404_v11 }
  0xa8   : > { %v475_v7 = vpop.permute.xlu0 %474  ;;  %v472_v8 = vmul.f32 %v470_v47, %v459_v53  ;;  %v480_v29 = vrot.slane %v471_v16, %v1465_v61  ;;  %v496_v36 = vrot.slane %v471_v16, %v1483_v1  ;;  %v512_v42 = vrot.slane %v471_v16, %v1488_v10 }
  0xa9   : > { %v437_v25 = vadd.f32 %v435_v15, %v421_v14  ;;  %v450_v28 = vmul.f32 %v445_v20, %v1490_v12  ;;  %v436_v3 = vadd.f32 %v434_v23, %v420_v21  ;;  %v623_v45 = vrot.slane %v1476_v0, %v622_v34 }
  0xaa   : > { %v1506_v32 = vpop.permute.xlu1 %490  ;;  %v484_v18 = vrot.slane %v472_v8, %v1465_v61  ;;  %v500_v37 = vrot.slane %v472_v8, %v1483_v1  ;;  %v485_v40 = vmul.f32 %v480_v29, %v475_v7  ;;  %v516_v44 = vrot.slane %v472_v8, %v1488_v10 }
  0xab   : > { %v453_v35 = vadd.f32 %v451_v26, %v437_v25  ;;  %v452_v39 = vadd.f32 %v450_v28, %v436_v3  ;;  %v501_v49 = vmul.f32 %v496_v36, %v1506_v32  ;;  %v528_v53 = vrot.slane %v471_v16, %v1499_v22 }
  0xac   : > { %v486_v30 = vmul.f32 %v484_v18, %v475_v7  ;;  %v502_v51 = vmul.f32 %v500_v37, %v1506_v32  ;;  %v532_v59 = vrot.slane %v472_v8, %v1499_v22  ;;  %v630_v63 = vcombine.low %v623_v45, %v627_v48 }
  0xad   : > { %v523_v19 = vpop.permute.xlu0 %522  ;;  %v487_v54 = vadd.f32 %v485_v40, %v452_v39  ;;  %v1571_v40 = vsub.s32 6, %v1461_v57 }
  0xae   : > { %v488_v41 = vadd.f32 %v486_v30, %v453_v35  ;;  %v533_v32 = vmul.f32 %v528_v53, %v523_v19  ;;  %v534_v14 = vmul.f32 %v532_v59, %v523_v19  ;;  %v1553_v60 = vmul.f32 %v630_v63, %v1383_v4 }
  0xaf   : > { %v1514_v46 = vpop.permute.xlu1 %506  ;;  %v503_v6 = vadd.f32 %v501_v49, %v487_v54  ;;  %v670_v19 = vsub.s32 5, %v1461_v57  ;;  %v1574_v49 = vsub.s32 7, %v1461_v57 }
  0xb0   : > { %v504_v55 = vadd.f32 %v502_v51, %v488_v41  ;;  %v518_v58 = vmul.f32 %v516_v44, %v1514_v46  ;;  %v641_v25 = vrot.slane %v1553_v60, %v1465_v61  ;;  %v645_v26 = vrot.slane %v1553_v60, %v622_v34 }
  0xb1   : > { %v540_v31 = vpop.permute.xlu0 %539  ;;  %v667_v36 = vrot.slane %v1553_v60, %v1483_v1  ;;  %v671_v34 = vrot.slane %v1553_v60, %v670_v19 }
  0xb2   : > { %v520_v13 = vadd.f32 %v518_v58, %v504_v55  ;;  %v651_v35 = vrot.slane %v641_v25, %v1465_v61  ;;  %v750_v58 = vrot.slane %v1476_v0, %v670_v19 }
  0xb3   : > { %v538_v56 = vpop.permute.xlu1 %537  ;;  %v677_v54 = vrot.slane %v667_v36, %v1483_v1 }
  0xb4   : > { %v545_v12 = vsel %vm541_vm3, 0.0, %v538_v56  ;;  %v542_v38 = vsel %vm541_vm3, %v538_v56, %v540_v31  ;;  %v517_v56 = vmul.f32 %v512_v42, %v1514_v46  ;;  %v536_v20 = vadd.f32 %v534_v14, %v520_v13 }
  0xb5   : > { %v554_v47 = vmul.f32 %v549_v24, %v545_v12  ;;  %v555_v52 = vmul.f32 %v553_v33, %v542_v38  ;;  %v590_v31 = vpop.permute.xlu0 %589 }
  0xb6   : > { %v519_v11 = vadd.f32 %v517_v56, %v503_v6  ;;  %v697_v56 = vrot.slane %v1553_v60, %v1571_v40 }
  0xb7   : > { %v558_v50 = vpop.permute.xlu1 %557  ;;  %v563_v7 = vrot.slane %v554_v47, %v1465_v61  ;;  %v567_v9 = vrot.slane %v555_v52, %v1465_v61  ;;  %v579_v46 = vrot.slane %v554_v47, %v1483_v1  ;;  %v583_v8 = vrot.slane %v555_v52, %v1483_v1 }
  0xb8   : > { %v535_v18 = vadd.f32 %v533_v32, %v519_v11  ;;  %v599_v30 = vrot.slane %v555_v52, %v1488_v10  ;;  %v611_v38 = vrot.slane %v554_v47, %v1499_v22  ;;  %v615_v39 = vrot.slane %v555_v52, %v1499_v22 }
  0xb9   : > { %v568_v15 = vmul.f32 %v563_v7, %v558_v50  ;;  %v569_v16 = vmul.f32 %v567_v9, %v558_v50  ;;  %v595_v50 = vrot.slane %v554_v47, %v1488_v10  ;;  %v681_v47 = vrot.slane %v671_v34, %v1483_v1 }
  0xba   : > { %v601_v12 = vmul.f32 %v599_v30, %v590_v31  ;;  %v662_v55 = vpop.permute.xlu0 %661  ;;  %v693_v52 = vrot.slane %v1553_v60, %v1488_v10  ;;  %v719_v7 = vrot.slane %v1553_v60, %v1499_v22  ;;  %v723_v9 = vrot.slane %v1553_v60, %v1574_v49 }
  0xbb   : > { %v570_v28 = vadd.f32 %v568_v15, %v535_v18  ;;  %v571_v29 = vadd.f32 %v569_v16, %v536_v20  ;;  %v600_v37 = vmul.f32 %v595_v50, %v590_v31  ;;  %v682_v13 = vmul.f32 %v677_v54, %v662_v55 }
  0xbc   : > { %v574_v27 = vpop.permute.xlu1 %573  ;;  %v683_v14 = vmul.f32 %v681_v47, %v662_v55  ;;  %v703_v15 = vrot.slane %v693_v52, %v1488_v10  ;;  %v707_v16 = vrot.slane %v697_v56, %v1488_v10  ;;  %v729_v20 = vrot.slane %v719_v7, %v1499_v22 }
  0xbd   : > { %v584_v21 = vmul.f32 %v579_v46, %v574_v27  ;;  %v585_v23 = vmul.f32 %v583_v8, %v574_v27  ;;  %v655_v27 = vrot.slane %v645_v26, %v1465_v61 }
  0xbf   : > { %v586_v33 = vadd.f32 %v584_v21, %v570_v28  ;;  %v587_v3 = vadd.f32 %v585_v23, %v571_v29  ;;  %v733_v21 = vrot.slane %v723_v9, %v1499_v22  ;;  %v759_v29 = vpop.permute.xlu0 %758 }
  0xc1   : > { %v606_v43 = vpop.permute.xlu1 %605  ;;  %v602_v42 = vadd.f32 %v600_v37, %v586_v33  ;;  %v603_v44 = vadd.f32 %v601_v12, %v587_v3 }
  0xc2   : > { %v616_v45 = vmul.f32 %v611_v38, %v606_v43  ;;  %v617_v48 = vmul.f32 %v615_v39, %v606_v43  ;;  %v754_v43 = vrot.slane %v1471_v62, %v670_v19  ;;  %v833_v39 = vrot.slane %v1476_v0, %v1571_v40 }
  0xc4   : > { %v618_v59 = vadd.f32 %v616_v45, %v602_v42  ;;  %v619_v63 = vadd.f32 %v617_v48, %v603_v44 }
  0xc6   : > { %v635_v2 = vpop.permute.xlu1 %634 }
  0xc7   : > { %v656_v51 = vmul.f32 %v651_v35, %v635_v2  ;;  %v657_v53 = vmul.f32 %v655_v27, %v635_v2 }
  0xc9   : > { %v658_v32 = vadd.f32 %v656_v51, %v618_v59  ;;  %v659_v11 = vadd.f32 %v657_v53, %v619_v63 }
  0xcb   : > { %v688_v17 = vpop.permute.xlu1 %687  ;;  %v684_v23 = vadd.f32 %v682_v13, %v658_v32  ;;  %v685_v25 = vadd.f32 %v683_v14, %v659_v11 }
  0xcc   : > { %v708_v26 = vmul.f32 %v703_v15, %v688_v17  ;;  %v709_v19 = vmul.f32 %v707_v16, %v688_v17  ;;  %v775_v17 = vpop.permute.xlu0 %774 }
  0xce   : > { %v710_v33 = vadd.f32 %v708_v26, %v684_v23  ;;  %v711_v3 = vadd.f32 %v709_v19, %v685_v25 }
  0xd0   : > { %v714_v24 = vpop.permute.xlu1 %713 }
  0xd1   : > { %v734_v30 = vmul.f32 %v729_v20, %v714_v24  ;;  %v735_v31 = vmul.f32 %v733_v21, %v714_v24 }
  0xd3   : > { %v736_v34 = vadd.f32 %v734_v30, %v710_v33  ;;  %v737_v37 = vadd.f32 %v735_v31, %v711_v3 }
  0xd4   : > { %v739_v41 = vpop.permute.xlu1 %738 }
  0xd8   : > { %v741_v57 = vpop.permute.xlu1 %740 }
  0xd9   : > { %v743_v6 = vsel %vm742_vm4, %v739_v41, %v741_v57  ;;  %v746_v2 = vsel %vm742_vm4, %v741_v57, 0.0  ;;  %v837_v41 = vrot.slane %v1471_v62, %v1571_v40 }
  0xda   : > { %v755_v46 = vmul.f32 %v750_v58, %v743_v6  ;;  %v756_v8 = vmul.f32 %v754_v43, %v746_v2  ;;  %v842_v6 = vpop.permute.xlu0 %841 }
  0xdc   : > { %v791_v18 = vpop.permute.xlu1 %790  ;;  %v764_v60 = vrot.slane %v755_v46, %v1465_v61  ;;  %v768_v28 = vrot.slane %v756_v8, %v1465_v61  ;;  %v780_v12 = vrot.slane %v755_v46, %v1483_v1  ;;  %v784_v38 = vrot.slane %v756_v8, %v1483_v1 }
  0xdd   : > { %v796_v44 = vrot.slane %v755_v46, %v1488_v10  ;;  %v800_v45 = vrot.slane %v756_v8, %v1488_v10  ;;  %v812_v2 = vrot.slane %v755_v46, %v1499_v22  ;;  %v816_v7 = vrot.slane %v756_v8, %v1499_v22 }
  0xde   : > { %v769_v35 = vmul.f32 %v764_v60, %v759_v29  ;;  %v770_v27 = vmul.f32 %v768_v28, %v759_v29  ;;  %v785_v51 = vmul.f32 %v780_v12, %v775_v17  ;;  %v786_v53 = vmul.f32 %v784_v38, %v775_v17  ;;  %v858_v25 = vpop.permute.xlu0 %857 }
  0xdf   : > { %v801_v57 = vmul.f32 %v796_v44, %v791_v18  ;;  %v802_v59 = vmul.f32 %v800_v45, %v791_v18  ;;  %v916_v46 = vrot.slane %v1476_v0, %v1574_v49  ;;  %v920_v8 = vrot.slane %v1471_v62, %v1574_v49 }
  0xe0   : > { %v771_v24 = vadd.f32 %v769_v35, %v736_v34  ;;  %v772_v42 = vadd.f32 %v770_v27, %v737_v37 }
  0xe1   : > { %v807_v50 = vpop.permute.xlu1 %806 }
  0xe2   : > { %v787_v56 = vadd.f32 %v785_v51, %v771_v24  ;;  %v788_v58 = vadd.f32 %v786_v53, %v772_v42  ;;  %v817_v11 = vmul.f32 %v812_v2, %v807_v50  ;;  %v818_v13 = vmul.f32 %v816_v7, %v807_v50  ;;  %v925_v62 = vpop.permute.xlu0 %924 }
  0xe4   : > { %v803_v9 = vadd.f32 %v801_v57, %v787_v56  ;;  %v804_v32 = vadd.f32 %v802_v59, %v788_v58 }
  0xe5   : > { %v822_v36 = vpop.permute.xlu1 %821 }
  0xe6   : > { %v819_v20 = vadd.f32 %v817_v11, %v803_v9  ;;  %v820_v21 = vadd.f32 %v818_v13, %v804_v32  ;;  %v1169_v32 = vld [vmem:[%s1650_s2 + $0x10] ss:$0 sm:$0xff]  ;;  %v1170_v11 = vld [vmem:[%s1650_s2 + $0x18] ss:$0 sm:$0xff] }
  0xe9   : > { %v824_v48 = vpop.permute.xlu1 %823 }
  0xea   : > { %v826_v54 = vsel %vm825_vm5, %v822_v36, %v824_v48  ;;  %v829_v47 = vsel %vm825_vm5, %v824_v48, 0.0 }
  0xeb   : > { %v838_v55 = vmul.f32 %v833_v39, %v826_v54  ;;  %v839_v52 = vmul.f32 %v837_v41, %v829_v47 }
  0xed   : > { %v874_v43 = vpop.permute.xlu1 %873  ;;  %v847_v40 = vrot.slane %v838_v55, %v1465_v61  ;;  %v851_v63 = vrot.slane %v839_v52, %v1465_v61  ;;  %v863_v18 = vrot.slane %v838_v55, %v1483_v1  ;;  %v867_v23 = vrot.slane %v839_v52, %v1483_v1 }
  0xee   : > { %v879_v28 = vrot.slane %v838_v55, %v1488_v10  ;;  %v883_v29 = vrot.slane %v839_v52, %v1488_v10  ;;  %v895_v0 = vrot.slane %v838_v55, %v1499_v22  ;;  %v899_v38 = vrot.slane %v839_v52, %v1499_v22  ;;  %v941_v55 = vpop.permute.xlu0 %940 }
  0xef   : > { %v852_v14 = vmul.f32 %v847_v40, %v842_v6  ;;  %v853_v15 = vmul.f32 %v851_v63, %v842_v6  ;;  %v868_v50 = vmul.f32 %v863_v18, %v858_v25  ;;  %v869_v30 = vmul.f32 %v867_v23, %v858_v25 }
  0xf0   : > { %v884_v36 = vmul.f32 %v879_v28, %v874_v43  ;;  %v885_v34 = vmul.f32 %v883_v29, %v874_v43 }
  0xf1   : > { %v854_v26 = vadd.f32 %v852_v14, %v819_v20  ;;  %v855_v19 = vadd.f32 %v853_v15, %v820_v21 }
  0xf2   : > { %v890_v16 = vpop.permute.xlu1 %889  ;;  %v1008_v13 = vpop.permute.xlu0 %1007 }
  0xf3   : > { %v870_v31 = vadd.f32 %v868_v50, %v854_v26  ;;  %v871_v33 = vadd.f32 %v869_v30, %v855_v19  ;;  %v900_v42 = vmul.f32 %v895_v0, %v890_v16  ;;  %v901_v44 = vmul.f32 %v899_v38, %v890_v16 }
  0xf5   : > { %v886_v49 = vadd.f32 %v884_v36, %v870_v31  ;;  %v887_v17 = vadd.f32 %v885_v34, %v871_v33 }
  0xf6   : > { %v905_v60 = vpop.permute.xlu1 %904  ;;  %v1024_v33 = vpop.permute.xlu0 %1023 }
  0xf7   : > { %v902_v51 = vadd.f32 %v900_v42, %v886_v49  ;;  %v903_v53 = vadd.f32 %v901_v44, %v887_v17 }
  0xfa   : > { %v907_v3 = vpop.permute.xlu1 %906 }
  0xfb   : > { %v909_v35 = vsel %vm908_vm6, %v905_v60, %v907_v3  ;;  %v912_v27 = vsel %vm908_vm6, %v907_v3, 0.0 }
  0xfc   : > { %v921_v37 = vmul.f32 %v916_v46, %v909_v35  ;;  %v922_v12 = vmul.f32 %v920_v8, %v912_v27 }
  0xfe   : > { %v930_v39 = vrot.slane %v921_v37, %v1465_v61  ;;  %v934_v41 = vrot.slane %v922_v12, %v1465_v61  ;;  %v957_v24 = vpop.permute.xlu1 %956  ;;  %v946_v54 = vrot.slane %v921_v37, %v1483_v1  ;;  %v950_v47 = vrot.slane %v922_v12, %v1483_v1 }
  0xff   : > { %v962_v43 = vrot.slane %v921_v37, %v1488_v10  ;;  %v966_v57 = vrot.slane %v922_v12, %v1488_v10  ;;  %v978_v14 = vrot.slane %v921_v37, %v1499_v22  ;;  %v982_v15 = vrot.slane %v922_v12, %v1499_v22 }
 0x100   : > { %v935_v45 = vmul.f32 %v930_v39, %v925_v62  ;;  %v936_v48 = vmul.f32 %v934_v41, %v925_v62  ;;  %v951_v59 = vmul.f32 %v946_v54, %v941_v55  ;;  %v952_v40 = vmul.f32 %v950_v47, %v941_v55 }
 0x101   : > { %v967_v7 = vmul.f32 %v962_v43, %v957_v24  ;;  %v968_v9 = vmul.f32 %v966_v57, %v957_v24 }
 0x102   : > { %v937_v56 = vadd.f32 %v935_v45, %v902_v51  ;;  %v938_v58 = vadd.f32 %v936_v48, %v903_v53  ;;  %v1086_v45 = vpop.permute.xlu0 %1085 }
 0x103   : > { %v973_v52 = vpop.permute.xlu1 %972 }
 0x104   : > { %v953_v6 = vadd.f32 %v951_v59, %v937_v56  ;;  %v954_v2 = vadd.f32 %v952_v40, %v938_v58  ;;  %v983_v19 = vmul.f32 %v978_v14, %v973_v52  ;;  %v984_v60 = vmul.f32 %v982_v15, %v973_v52 }
 0x106   : > { %v969_v20 = vadd.f32 %v967_v7, %v953_v6  ;;  %v970_v21 = vadd.f32 %v968_v9, %v954_v2 }
 0x107   : > { %v988_v63 = vpop.permute.xlu1 %987 }
 0x108   : > { %v985_v29 = vadd.f32 %v983_v19, %v969_v20  ;;  %v986_v50 = vadd.f32 %v984_v60, %v970_v21 }
 0x10b   : > { %v990_v16 = vpop.permute.xlu1 %989 }
 0x10c   : > { %v992_v18 = vsel %vm991_vm7, %v988_v63, %v990_v16  ;;  %v995_v23 = vsel %vm991_vm7, %v990_v16, 0.0 }
 0x10d   : > { %v1004_v25 = vmul.f32 %v1169_v32, %v992_v18  ;;  %v1005_v26 = vmul.f32 %v1170_v11, %v995_v23 }
 0x10f   : > { %v1013_v46 = vrot.slane %v1004_v25, %v1465_v61  ;;  %v1017_v8 = vrot.slane %v1005_v26, %v1465_v61  ;;  %v1040_v28 = vpop.permute.xlu1 %1039  ;;  %v1029_v30 = vrot.slane %v1004_v25, %v1483_v1  ;;  %v1033_v31 = vrot.slane %v1005_v26, %v1483_v1 }
 0x110   : > { %v1045_v27 = vrot.slane %v1004_v25, %v1488_v10  ;;  %v1049_v36 = vrot.slane %v1005_v26, %v1488_v10  ;;  %v1061_v61 = vrot.slane %v1004_v25, %v1499_v22  ;;  %v1065_v38 = vrot.slane %v1005_v26, %v1499_v22 }
 0x111   : > { %v1018_v3 = vmul.f32 %v1013_v46, %v1008_v13  ;;  %v1019_v35 = vmul.f32 %v1017_v8, %v1008_v13  ;;  %v1034_v12 = vmul.f32 %v1029_v30, %v1024_v33  ;;  %v1035_v0 = vmul.f32 %v1033_v31, %v1024_v33 }
 0x112   : > { %v1050_v49 = vmul.f32 %v1045_v27, %v1040_v28  ;;  %v1051_v17 = vmul.f32 %v1049_v36, %v1040_v28 }
 0x113   : > { %v1020_v34 = vadd.f32 %v1018_v3, %v985_v29  ;;  %v1021_v37 = vadd.f32 %v1019_v35, %v986_v50 }
 0x114   : > { %v1056_v62 = vpop.permute.xlu1 %1055 }
 0x115   : > { %v1036_v39 = vadd.f32 %v1034_v12, %v1020_v34  ;;  %v1037_v1 = vadd.f32 %v1035_v0, %v1021_v37  ;;  %v1066_v41 = vmul.f32 %v1061_v61, %v1056_v62  ;;  %v1067_v24 = vmul.f32 %v1065_v38, %v1056_v62 }
 0x117   : > { %v1052_v42 = vadd.f32 %v1050_v49, %v1036_v39  ;;  %v1053_v44 = vadd.f32 %v1051_v17, %v1037_v1 }
 0x119   : > { %v1068_v10 = vadd.f32 %v1066_v41, %v1052_v42  ;;  %v1069_v48 = vadd.f32 %v1067_v24, %v1053_v44  ;;  %v1093_v51 = vpop.permute.xlu1 %1092 }
 0x11b   : > { %v1088_v53 = vmul.f32 %v1086_v45, %v1068_v10  ;;  %v1089_v54 = vmul.f32 %v1086_v45, %v1069_v48 }
 0x11d   : > { %v1095_v47 = vadd.f32 %v1093_v51, %v1088_v53  ;;  %v1096_v55 = vadd.f32 %v1093_v51, %v1089_v54 }
 0x11f   : > { %v1098_v22 = vadd.f32 %v1095_v47, %v1383_v4  ;;  %v1099_v52 = vadd.f32 %v1096_v55, %v1389_v5 }
 0x121   : > { %v1102_v56 = vcombine.low %v1098_v22, %v1099_v52 }
 0x123   : > { %1104 = vst [vmem:[%s278_s15] sm:$0xff] %v1102_v56 }
 0x124 PF: > { %s17_s24 = sadd.s32 1, %s1274_s24  }
 0x125   : > { %p14_p4 = scmp.ge.s32.totalorder %s17_s24, 4  }
 0x127   :  { %16 = sbr.rel (!%p14_p4) target bundleno = 1 (0x1), region = 78 }

</bundles_post_ra>
